<compile_context>
chip_gen: v6e
topology: v6e:2x2x1
jax: 0.10.0
libtpu: 0.0.40
codegen_flags: <defaults>
</compile_context>

<pallas_src>
import math

import jax
import jax.numpy as jnp
from jax import lax
from jax.experimental import pallas as pl
from jax.experimental.pallas import tpu as pltpu


# ----------------------------------------------------------------------------
# Pallas kernel for one Mamba block (one batch tile per grid step, time-major)
# ----------------------------------------------------------------------------
def make_mamba_kernel(Bb, T, E, d_inner, d_state, d_conv, pad, mxu_dtype):
    rows = T * Bb                      # time-major rows: row r = t*Bb + b
    SN = d_state * d_inner
    unroll = math.gcd(T, 8)

    def kernel(x_ref, w_in_ref, conv_w_ref, conv_b_ref, w_xp_ref, b_dt_ref,
               a_ref, d_ref, w_out_ref,
               o_ref,
               conv_scr, da_scr, dbu_scr, h_scr):
        f32 = jnp.float32
        x = x_ref[0].astype(mxu_dtype)                                   # (rows, E)

        # 1) fused input projection -> [x_inner | z]
        xz = jnp.dot(x, w_in_ref[...], preferred_element_type=f32)      # (rows, 2*d_inner)
        xi = xz[:, :d_inner]
        z = xz[:, d_inner:]

        # 2) causal depthwise conv along time (+bias, SiLU).  Rows are
        #    time-major, so tap s is a shift by s*Bb rows; rows with t < s
        #    land in the zeroed pad region -> no boundary mask needed.
        conv_scr[pl.ds(0, pad), :] = jnp.zeros((pad, d_inner), f32)
        conv_scr[pl.ds(pad, rows), :] = xi
        acc = xi * conv_w_ref[pl.ds(d_conv - 1, 1), :]
        for s in range(1, d_conv):                                       # tiny static unroll
            shifted = conv_scr[pl.ds(pad - s * Bb, rows), :]
            acc = acc + shifted * conv_w_ref[pl.ds(d_conv - 1 - s, 1), :]
        acc = acc + conv_b_ref[...]
        u = acc * jax.nn.sigmoid(acc)                                    # SiLU, f32

        # 3) fused x_proj -> [dt_pre | B | C]   (dt weight pre-folded w_x_dt @ w_dt)
        dtbc = jnp.dot(u.astype(mxu_dtype), w_xp_ref[...],
                       preferred_element_type=f32)                       # (rows, d_inner+2*d_state)
        dt_pre = dtbc[:, :d_inner] + b_dt_ref[...]
        b_mat = dtbc[:, d_inner:d_inner + d_state]                       # (rows, d_state)
        c_mat = dtbc[:, d_inner + d_state:]                              # (rows, d_state)

        # 4) softplus (numerically stable), f32
        dt = jnp.maximum(dt_pre, 0.0) + jnp.log(1.0 + jnp.exp(-jnp.abs(dt_pre)))
        w_du = dt * u                                                    # (rows, d_inner)

        # 5) precompute scan coefficients for ALL timesteps, per state s
        #    (pure VPU/EUP broadcasts into lane slices; no MXU, no big concat
        #    temporaries, no e_mat/f_mat constants).  Column s*d_inner + i
        #    <-> (state s, channel i).
        for s in range(d_state):
            cols = pl.ds(s * d_inner, d_inner)
            da_scr[:, cols] = jnp.exp(dt * a_ref[pl.ds(s, 1), :])        # exp(dt*A[:,s])
            dbu_scr[:, cols] = b_mat[:, s:s + 1] * w_du                  # B_t (x) (dt_t*u_t)

        # 6) selective scan: h_t = exp(dt_t*A)*h_{t-1} + B_t(x)(dt_t*u_t)
        #    T serial steps over (Bb, SN) blocks; h is zero at t=0, so no
        #    reset mask; unrolled so future-step loads hoist off the FMA chain.
        def scan_body(t, h):
            r0 = t * Bb
            da_t = da_scr[pl.ds(r0, Bb), :]
            dbu_t = dbu_scr[pl.ds(r0, Bb), :]
            h = da_t * h + dbu_t
            h_scr[pl.ds(r0, Bb), :] = h
            return h

        lax.fori_loop(0, T, scan_body, jnp.zeros((Bb, SN), jnp.float32),
                      unroll=unroll)

        # 7) y_t = C_t . h_t for all t: unrolled d_state-term VPU fold over
        #    lane slices of the stored h (no f_mat matmul).
        y = c_mat[:, 0:1] * h_scr[:, pl.ds(0, d_inner)]
        for s in range(1, d_state):
            y = y + c_mat[:, s:s + 1] * h_scr[:, pl.ds(s * d_inner, d_inner)]

        # 8) skip term, gate with SiLU(z), output projection
        y = y + u * d_ref[...]
        y = y * (z * jax.nn.sigmoid(z))
        o_ref[0] = jnp.dot(y.astype(mxu_dtype), w_out_ref[...],
                           preferred_element_type=f32).astype(o_ref.dtype)

    return kernel


# ----------------------------------------------------------------------------
# Wrapper: fuse / pre-transpose weights once, then call the kernel per block
# ----------------------------------------------------------------------------
def prepare_block_params(p, mxu_dtype=jnp.bfloat16):
    f32 = jnp.float32
    w_in = jnp.concatenate([p["w_in_x"], p["w_in_z"]], axis=1).astype(mxu_dtype)
    w_dt_fold = (p["w_x_dt"] @ p["w_dt"]).astype(f32)                    # (d_inner, d_inner)
    w_xp = jnp.concatenate([w_dt_fold, p["w_x_b"], p["w_x_c"]], axis=1).astype(mxu_dtype)
    return dict(w_in=w_in,
                conv_w=p["conv_w"].astype(f32), conv_b=p["conv_b"].astype(f32),
                w_xp=w_xp, b_dt=p["b_dt"].astype(f32),
                a_t=p["A_T"].astype(f32),                                # (d_state, d_inner)
                D=p["D"].astype(f32),
                w_out=p["w_out"].astype(mxu_dtype))


def _nbytes(shape, dtype):
    return math.prod(shape) * jnp.dtype(dtype).itemsize


def mamba_block_forward(x, kp, d_state, d_conv, mxu_dtype=jnp.bfloat16,
                        batch_tile=None):
    B, T, E = x.shape
    d_inner = kp["conv_w"].shape[1]
    SN = d_state * d_inner

    # Batch tile: default to two tiles when possible so v7x's second
    # TensorCore gets work and input/output DMA pipelines under compute.
    if batch_tile is None:
        batch_tile = B // 2 if (B >= 2 and B % 2 == 0) else B
    Bb = max(1, min(batch_tile, B))
    while B % Bb != 0:
        Bb -= 1
    nb = B // Bb
    rows = T * Bb
    pad = max(8, -(-((d_conv - 1) * Bb) // 8) * 8)                       # sublane-aligned zero pad

    kernel = make_mamba_kernel(Bb, T, E, d_inner, d_state, d_conv, pad, mxu_dtype)

    weights = [kp["w_in"], kp["conv_w"], kp["conv_b"], kp["w_xp"], kp["b_dt"],
               kp["a_t"], kp["D"], kp["w_out"]]

    # time-major rows within each batch tile (wrapper-side layout plumbing)
    x_t = x.reshape(nb, Bb, T, E).transpose(0, 2, 1, 3).reshape(nb, rows, E)

    def const_spec(a):
        n = a.ndim
        return pl.BlockSpec(a.shape, lambda i, n=n: (0,) * n)

    in_specs = ([pl.BlockSpec((1, rows, E), lambda i: (i, 0, 0))]
                + [const_spec(w) for w in weights])
    out_specs = pl.BlockSpec((1, rows, E), lambda i: (i, 0, 0))

    scratch = [
        pltpu.VMEM((pad + rows, d_inner), jnp.float32),   # zero-padded conv input
        pltpu.VMEM((rows, SN), jnp.float32),              # exp(dt*A) for all t (time-major)
        pltpu.VMEM((rows, SN), jnp.float32),              # B_t (x) (dt_t*u_t) for all t
        pltpu.VMEM((rows, SN), jnp.float32),              # h_t for all t
    ]

    # explicit VMEM budget (double-buffered I/O tiles + weights + scratches)
    est = (4 * _nbytes((1, rows, E), x.dtype)
           + 2 * sum(_nbytes(w.shape, w.dtype) for w in weights)
           + _nbytes((pad + rows, d_inner), jnp.float32)
           + 3 * _nbytes((rows, SN), jnp.float32))
    vmem_limit = int(min(64 * 2 ** 20, max(16 * 2 ** 20, 2 * est)))

    out = pl.pallas_call(
        kernel,
        out_shape=jax.ShapeDtypeStruct((nb, rows, E), x.dtype),
        grid=(nb,),
        in_specs=in_specs,
        out_specs=out_specs,
        scratch_shapes=scratch,
        compiler_params=pltpu.CompilerParams(
            dimension_semantics=("parallel",),
            vmem_limit_bytes=vmem_limit),
    )(x_t, *weights)

    return out.reshape(nb, T, Bb, E).transpose(0, 2, 1, 3).reshape(B, T, E)


def mamba_blocks_forward(x, params_list, d_state, d_conv,
                         mxu_dtype=jnp.bfloat16, batch_tile=None):
    out = x
    for p in params_list:
        kp = prepare_block_params(p, mxu_dtype)
        out = mamba_block_forward(out, kp, d_state, d_conv, mxu_dtype, batch_tile)
    return out


# ----------------------------------------------------------------------------
# Pure-JAX reference (module-faithful math, f32) for verification
# ----------------------------------------------------------------------------
def mamba_block_ref(x, p, d_state, d_conv):
    B, T, E = x.shape
    xi = x @ p["w_in_x"]
    z = x @ p["w_in_z"]
    xp = jnp.pad(xi, ((0, 0), (d_conv - 1, 0), (0, 0)))
    u = jnp.zeros_like(xi)
    for k in range(d_conv):
        u = u + xp[:, k:k + T, :] * p["conv_w"][k][None, None, :]
    u = u + p["conv_b"][None]
    u = u * jax.nn.sigmoid(u)
    dt = jax.nn.softplus(u @ p["w_x_dt"] @ p["w_dt"] + p["b_dt"][None])
    b_mat = u @ p["w_x_b"]
    c_mat = u @ p["w_x_c"]
    A = p["A_T"].T                                                       # (d_inner, d_state)

    def step(h, xs):
        dt_t, u_t, b_t, c_t = xs
        da = jnp.exp(dt_t[..., None] * A[None, :, :])
        dbu = (dt_t * u_t)[..., None] * b_t[:, None, :]
        h = da * h + dbu
        y = jnp.einsum("bis,bs->bi", h, c_t)
        return h, y

    h0 = jnp.zeros((B, u.shape[-1], d_state), jnp.float32)
    xs = (dt.transpose(1, 0, 2), u.transpose(1, 0, 2),
          b_mat.transpose(1, 0, 2), c_mat.transpose(1, 0, 2))
    _, ys = lax.scan(step, h0, xs)
    y = ys.transpose(1, 0, 2) + u * p["D"][None]
    y = y * (z * jax.nn.sigmoid(z))
    return y @ p["w_out"]


def mamba_blocks_ref(x, params_list, d_state, d_conv):
    out = x
    for p in params_list:
        out = mamba_block_ref(out, p, d_state, d_conv)
    return out


# ----------------------------------------------------------------------------
# Deterministic synthetic parameter init (module form)
# ----------------------------------------------------------------------------
def init_mamba_params(key, d_model, d_state, d_conv, expand):
    d_inner = expand * d_model
    dt_rank = math.ceil(d_model / 16)
    ks = jax.random.split(key, 8)
    f32 = jnp.float32

    w_in_x = jax.random.normal(ks[0], (d_model, d_inner), f32) / math.sqrt(d_model)
    w_in_z = jax.random.normal(ks[1], (d_model, d_inner), f32) / math.sqrt(d_model)
    conv_w = jax.random.normal(ks[2], (d_conv, d_inner), f32) / math.sqrt(d_conv)
    conv_b = 0.1 * jax.random.normal(ks[3], (1, d_inner), f32)
    w_x_dt = jax.random.normal(ks[4], (d_inner, dt_rank), f32) / math.sqrt(d_inner)
    w_x_b = jax.random.normal(ks[5], (d_inner, d_state), f32) / math.sqrt(d_inner)
    w_x_c = jax.random.normal(ks[6], (d_inner, d_state), f32) / math.sqrt(d_inner)
    w_dt = jax.random.normal(ks[7], (dt_rank, d_inner), f32) / math.sqrt(dt_rank)
    b_dt = jnp.full((1, d_inner), -3.0, f32)                             # softplus(-3) ~ 0.049
    # S4D-real style A init: A = -exp(A_log), A_log[c, s] = log(s + 1)
    a_log = jnp.log(jnp.arange(1, d_state + 1, dtype=f32))[None, :] * jnp.ones((d_inner, 1), f32)
    A_T = (-jnp.exp(a_log)).T                                            # (d_state, d_inner)
    D = jnp.ones((1, d_inner), f32)
    w_out = jax.random.normal(jax.random.fold_in(key, 123),
                              (d_inner, d_model), f32) / math.sqrt(d_inner)
    return dict(w_in_x=w_in_x, w_in_z=w_in_z, conv_w=conv_w, conv_b=conv_b,
                w_x_dt=w_x_dt, w_x_b=w_x_b, w_x_c=w_x_c, w_dt=w_dt, b_dt=b_dt,
                A_T=A_T, D=D, w_out=w_out)


if __name__ == "__main__":
    # MambaBlocks(num=2, d_model=32, d_state=16, d_conv=4, expand=2)
    num, d_model, d_state, d_conv, expand = 2, 32, 16, 4, 2
    B, T = 2, 8

    key = jax.random.PRNGKey(0)
    kx, kp = jax.random.split(key)
    x = jax.random.normal(kx, (B, T, d_model), jnp.float32)
    params_list = [init_mamba_params(k, d_model, d_state, d_conv, expand)
                   for k in jax.random.split(kp, num)]

    # Verification run: f32 MXU operands preserve exact module semantics.
    out = mamba_blocks_forward(x, params_list, d_state, d_conv,
                               mxu_dtype=jnp.float32)
    out = jax.block_until_ready(out)

    ref = jax.block_until_ready(mamba_blocks_ref(x, params_list, d_state, d_conv))
    assert out.shape == (B, T, d_model)
    assert bool(jnp.allclose(out, ref, atol=1e-2, rtol=1e-2)), \
        f"max abs err {float(jnp.max(jnp.abs(out - ref)))}"

    # Production path: bf16 MXU operands (f32 accumulation / elementwise).
    out_bf16 = jax.block_until_ready(
        mamba_blocks_forward(x, params_list, d_state, d_conv))
    assert out_bf16.shape == (B, T, d_model)
    assert bool(jnp.all(jnp.isfinite(out_bf16)))

    print("KERNEL_OK")
</pallas_src>

<mosaic_0001>
module attributes {stable_mosaic.version = 11 : i64} {
  func.func @kernel(%arg0: i32, %arg1: memref<1x8x32xf32, #tpu.memory_space<vmem>>, %arg2: memref<32x128xf32, #tpu.memory_space<vmem>>, %arg3: memref<4x64xf32, #tpu.memory_space<vmem>>, %arg4: memref<1x64xf32, #tpu.memory_space<vmem>>, %arg5: memref<64x96xf32, #tpu.memory_space<vmem>>, %arg6: memref<1x64xf32, #tpu.memory_space<vmem>>, %arg7: memref<16x64xf32, #tpu.memory_space<vmem>>, %arg8: memref<1x64xf32, #tpu.memory_space<vmem>>, %arg9: memref<64x32xf32, #tpu.memory_space<vmem>>, %arg10: memref<1x8x32xf32, #tpu.memory_space<vmem>>, %arg11: memref<16x64xf32, #tpu.memory_space<vmem>>, %arg12: memref<8x1024xf32, #tpu.memory_space<vmem>>, %arg13: memref<8x1024xf32, #tpu.memory_space<vmem>>, %arg14: memref<8x1024xf32, #tpu.memory_space<vmem>>) attributes {dimension_semantics = [#tpu.dimension_semantics<parallel>], iteration_bounds = array<i64: 2>, scalar_prefetch = 0 : i64, scratch_operands = 4 : i64, tpu.core_type = #tpu.core_type<tc>, window_params = [{transform_indices = @transform_0, window_bounds = array<i64: 1, 8, 32>}, {pipeline_mode = #tpu.pipeline_mode<synchronous>, transform_indices = @transform_1, window_bounds = array<i64: 32, 128>}, {pipeline_mode = #tpu.pipeline_mode<synchronous>, transform_indices = @transform_2, window_bounds = array<i64: 4, 64>}, {pipeline_mode = #tpu.pipeline_mode<synchronous>, transform_indices = @transform_3, window_bounds = array<i64: 1, 64>}, {pipeline_mode = #tpu.pipeline_mode<synchronous>, transform_indices = @transform_4, window_bounds = array<i64: 64, 96>}, {pipeline_mode = #tpu.pipeline_mode<synchronous>, transform_indices = @transform_5, window_bounds = array<i64: 1, 64>}, {pipeline_mode = #tpu.pipeline_mode<synchronous>, transform_indices = @transform_6, window_bounds = array<i64: 16, 64>}, {pipeline_mode = #tpu.pipeline_mode<synchronous>, transform_indices = @transform_7, window_bounds = array<i64: 1, 64>}, {pipeline_mode = #tpu.pipeline_mode<synchronous>, transform_indices = @transform_8, window_bounds = array<i64: 64, 32>}, {transform_indices = @transform_9, window_bounds = array<i64: 1, 8, 32>}]} {
    %c0 = arith.constant 0 : index
    %c0_0 = arith.constant 0 : index
    %c0_1 = arith.constant 0 : index
    %0 = vector.load %arg1[%c0, %c0_0, %c0_1] : memref<1x8x32xf32, #tpu.memory_space<vmem>>, vector<1x8x32xf32>
    %1 = vector.shape_cast %0 : vector<1x8x32xf32> to vector<8x32xf32>
    %c0_2 = arith.constant 0 : index
    %c0_3 = arith.constant 0 : index
    %2 = vector.load %arg2[%c0_2, %c0_3] : memref<32x128xf32, #tpu.memory_space<vmem>>, vector<32x128xf32>
    %cst = arith.constant dense<0.000000e+00> : vector<8x128xf32>
    %3 = tpu.matmul %1, %2, %cst {dimension_numbers = #tpu.dot_dimension_numbers<[1], [0], [0], [1], [0, 0, 1, 1], [], []>} : vector<8x32xf32>, vector<32x128xf32>, vector<8x128xf32> -> vector<8x128xf32>
    %4 = vector.extract_strided_slice %3 {offsets = [0, 0], sizes = [8, 64], strides = [1, 1]} : vector<8x128xf32> to vector<8x64xf32>
    %5 = vector.extract_strided_slice %3 {offsets = [0, 64], sizes = [8, 64], strides = [1, 1]} : vector<8x128xf32> to vector<8x64xf32>
    %cst_4 = arith.constant 0.000000e+00 : f32
    %6 = vector.broadcast %cst_4 : f32 to vector<8x64xf32>
    %c0_5 = arith.constant 0 : index
    %c0_6 = arith.constant 0 : index
    %7 = vector.load %arg11[%c0_5, %c0_6] : memref<16x64xf32, #tpu.memory_space<vmem>>, vector<8x64xf32>
    tpu.vector_store %arg11[%c0_5, %c0_6], %6 {strides = array<i32>} : memref<16x64xf32, #tpu.memory_space<vmem>>, vector<8x64xf32>,
    %c8 = arith.constant 8 : index
    %c0_7 = arith.constant 0 : index
    %8 = vector.load %arg11[%c8, %c0_7] : memref<16x64xf32, #tpu.memory_space<vmem>>, vector<8x64xf32>
    tpu.vector_store %arg11[%c8, %c0_7], %4 {strides = array<i32>} : memref<16x64xf32, #tpu.memory_space<vmem>>, vector<8x64xf32>,
    %c3 = arith.constant 3 : index
    %c0_8 = arith.constant 0 : index
    %9 = vector.load %arg3[%c3, %c0_8] : memref<4x64xf32, #tpu.memory_space<vmem>>, vector<1x64xf32>
    %10 = vector.broadcast %9 : vector<1x64xf32> to vector<8x64xf32>
    %11 = arith.mulf %4, %10 : vector<8x64xf32>
    %c7 = arith.constant 7 : index
    %c0_9 = arith.constant 0 : index
    %12 = vector.load %arg11[%c7, %c0_9] : memref<16x64xf32, #tpu.memory_space<vmem>>, vector<8x64xf32>
    %c2 = arith.constant 2 : index
    %c0_10 = arith.constant 0 : index
    %13 = vector.load %arg3[%c2, %c0_10] : memref<4x64xf32, #tpu.memory_space<vmem>>, vector<1x64xf32>
    %14 = vector.broadcast %13 : vector<1x64xf32> to vector<8x64xf32>
    %15 = arith.mulf %12, %14 : vector<8x64xf32>
    %16 = arith.addf %11, %15 : vector<8x64xf32>
    %c6 = arith.constant 6 : index
    %c0_11 = arith.constant 0 : index
    %17 = vector.load %arg11[%c6, %c0_11] : memref<16x64xf32, #tpu.memory_space<vmem>>, vector<8x64xf32>
    %c1 = arith.constant 1 : index
    %c0_12 = arith.constant 0 : index
    %18 = vector.load %arg3[%c1, %c0_12] : memref<4x64xf32, #tpu.memory_space<vmem>>, vector<1x64xf32>
    %19 = vector.broadcast %18 : vector<1x64xf32> to vector<8x64xf32>
    %20 = arith.mulf %17, %19 : vector<8x64xf32>
    %21 = arith.addf %16, %20 : vector<8x64xf32>
    %c5 = arith.constant 5 : index
    %c0_13 = arith.constant 0 : index
    %22 = vector.load %arg11[%c5, %c0_13] : memref<16x64xf32, #tpu.memory_space<vmem>>, vector<8x64xf32>
    %c0_14 = arith.constant 0 : index
    %c0_15 = arith.constant 0 : index
    %23 = vector.load %arg3[%c0_14, %c0_15] : memref<4x64xf32, #tpu.memory_space<vmem>>, vector<1x64xf32>
    %24 = vector.broadcast %23 : vector<1x64xf32> to vector<8x64xf32>
    %25 = arith.mulf %22, %24 : vector<8x64xf32>
    %26 = arith.addf %21, %25 : vector<8x64xf32>
    %c0_16 = arith.constant 0 : index
    %c0_17 = arith.constant 0 : index
    %27 = vector.load %arg4[%c0_16, %c0_17] : memref<1x64xf32, #tpu.memory_space<vmem>>, vector<1x64xf32>
    %28 = vector.broadcast %27 : vector<1x64xf32> to vector<8x64xf32>
    %29 = arith.addf %26, %28 : vector<8x64xf32>
    %30 = arith.negf %29 : vector<8x64xf32>
    %31 = math.exp %30 : vector<8x64xf32>
    %cst_18 = arith.constant 1.000000e+00 : f32
    %32 = vector.broadcast %cst_18 : f32 to vector<8x64xf32>
    %33 = arith.addf %32, %31 : vector<8x64xf32>
    %34 = arith.divf %32, %33 : vector<8x64xf32>
    %35 = arith.mulf %29, %34 : vector<8x64xf32>
    %c0_19 = arith.constant 0 : index
    %c0_20 = arith.constant 0 : index
    %36 = vector.load %arg5[%c0_19, %c0_20] : memref<64x96xf32, #tpu.memory_space<vmem>>, vector<64x96xf32>
    %cst_21 = arith.constant dense<0.000000e+00> : vector<8x96xf32>
    %37 = tpu.matmul %35, %36, %cst_21 {dimension_numbers = #tpu.dot_dimension_numbers<[1], [0], [0], [1], [0, 0, 1, 1], [], []>} : vector<8x64xf32>, vector<64x96xf32>, vector<8x96xf32> -> vector<8x96xf32>
    %38 = vector.extract_strided_slice %37 {offsets = [0, 0], sizes = [8, 64], strides = [1, 1]} : vector<8x96xf32> to vector<8x64xf32>
    %c0_22 = arith.constant 0 : index
    %c0_23 = arith.constant 0 : index
    %39 = vector.load %arg6[%c0_22, %c0_23] : memref<1x64xf32, #tpu.memory_space<vmem>>, vector<1x64xf32>
    %40 = vector.broadcast %39 : vector<1x64xf32> to vector<8x64xf32>
    %41 = arith.addf %38, %40 : vector<8x64xf32>
    %42 = vector.extract_strided_slice %37 {offsets = [0, 64], sizes = [8, 16], strides = [1, 1]} : vector<8x96xf32> to vector<8x16xf32>
    %43 = vector.extract_strided_slice %37 {offsets = [0, 80], sizes = [8, 16], strides = [1, 1]} : vector<8x96xf32> to vector<8x16xf32>
    %cst_24 = arith.constant 0.000000e+00 : f32
    %44 = vector.broadcast %cst_24 : f32 to vector<8x64xf32>
    %45 = arith.maximumf %41, %44 : vector<8x64xf32>
    %46 = math.absf %41 : vector<8x64xf32>
    %cst_25 = arith.constant 0.000000e+00 : f32
    %47 = vector.broadcast %cst_25 : f32 to vector<8x64xf32>
    %48 = arith.subf %47, %46 : vector<8x64xf32>
    %49 = math.exp %48 : vector<8x64xf32>
    %cst_26 = arith.constant 1.000000e+00 : f32
    %50 = vector.broadcast %cst_26 : f32 to vector<8x64xf32>
    %51 = arith.addf %50, %49 : vector<8x64xf32>
    %52 = math.log %51 : vector<8x64xf32>
    %53 = arith.addf %45, %52 : vector<8x64xf32>
    %54 = arith.mulf %53, %35 : vector<8x64xf32>
    %c0_27 = arith.constant 0 : index
    %c0_28 = arith.constant 0 : index
    %55 = vector.load %arg7[%c0_27, %c0_28] : memref<16x64xf32, #tpu.memory_space<vmem>>, vector<1x64xf32>
    %56 = vector.broadcast %55 : vector<1x64xf32> to vector<8x64xf32>
    %57 = arith.mulf %53, %56 : vector<8x64xf32>
    %58 = math.exp %57 : vector<8x64xf32>
    %c0_29 = arith.constant 0 : index
    %c0_30 = arith.constant 0 : index
    %59 = vector.load %arg12[%c0_29, %c0_30] : memref<8x1024xf32, #tpu.memory_space<vmem>>, vector<8x64xf32>
    tpu.vector_store %arg12[%c0_29, %c0_30], %58 {strides = array<i32>} : memref<8x1024xf32, #tpu.memory_space<vmem>>, vector<8x64xf32>,
    %60 = vector.extract_strided_slice %42 {offsets = [0, 0], sizes = [8, 1], strides = [1, 1]} : vector<8x16xf32> to vector<8x1xf32>
    %61 = vector.broadcast %60 : vector<8x1xf32> to vector<8x64xf32>
    %62 = arith.mulf %61, %54 : vector<8x64xf32>
    %c0_31 = arith.constant 0 : index
    %c0_32 = arith.constant 0 : index
    %63 = vector.load %arg13[%c0_31, %c0_32] : memref<8x1024xf32, #tpu.memory_space<vmem>>, vector<8x64xf32>
    tpu.vector_store %arg13[%c0_31, %c0_32], %62 {strides = array<i32>} : memref<8x1024xf32, #tpu.memory_space<vmem>>, vector<8x64xf32>,
    %c1_33 = arith.constant 1 : index
    %c0_34 = arith.constant 0 : index
    %64 = vector.load %arg7[%c1_33, %c0_34] : memref<16x64xf32, #tpu.memory_space<vmem>>, vector<1x64xf32>
    %65 = vector.broadcast %64 : vector<1x64xf32> to vector<8x64xf32>
    %66 = arith.mulf %53, %65 : vector<8x64xf32>
    %67 = math.exp %66 : vector<8x64xf32>
    %c0_35 = arith.constant 0 : index
    %c64 = arith.constant 64 : index
    %68 = vector.load %arg12[%c0_35, %c64] : memref<8x1024xf32, #tpu.memory_space<vmem>>, vector<8x64xf32>
    tpu.vector_store %arg12[%c0_35, %c64], %67 {strides = array<i32>} : memref<8x1024xf32, #tpu.memory_space<vmem>>, vector<8x64xf32>,
    %69 = vector.extract_strided_slice %42 {offsets = [0, 1], sizes = [8, 1], strides = [1, 1]} : vector<8x16xf32> to vector<8x1xf32>
    %70 = vector.broadcast %69 : vector<8x1xf32> to vector<8x64xf32>
    %71 = arith.mulf %70, %54 : vector<8x64xf32>
    %c0_36 = arith.constant 0 : index
    %c64_37 = arith.constant 64 : index
    %72 = vector.load %arg13[%c0_36, %c64_37] : memref<8x1024xf32, #tpu.memory_space<vmem>>, vector<8x64xf32>
    tpu.vector_store %arg13[%c0_36, %c64_37], %71 {strides = array<i32>} : memref<8x1024xf32, #tpu.memory_space<vmem>>, vector<8x64xf32>,
    %c2_38 = arith.constant 2 : index
    %c0_39 = arith.constant 0 : index
    %73 = vector.load %arg7[%c2_38, %c0_39] : memref<16x64xf32, #tpu.memory_space<vmem>>, vector<1x64xf32>
    %74 = vector.broadcast %73 : vector<1x64xf32> to vector<8x64xf32>
    %75 = arith.mulf %53, %74 : vector<8x64xf32>
    %76 = math.exp %75 : vector<8x64xf32>
    %c0_40 = arith.constant 0 : index
    %c128 = arith.constant 128 : index
    %77 = vector.load %arg12[%c0_40, %c128] : memref<8x1024xf32, #tpu.memory_space<vmem>>, vector<8x64xf32>
    tpu.vector_store %arg12[%c0_40, %c128], %76 {strides = array<i32>} : memref<8x1024xf32, #tpu.memory_space<vmem>>, vector<8x64xf32>,
    %78 = vector.extract_strided_slice %42 {offsets = [0, 2], sizes = [8, 1], strides = [1, 1]} : vector<8x16xf32> to vector<8x1xf32>
    %79 = vector.broadcast %78 : vector<8x1xf32> to vector<8x64xf32>
    %80 = arith.mulf %79, %54 : vector<8x64xf32>
    %c0_41 = arith.constant 0 : index
    %c128_42 = arith.constant 128 : index
    %81 = vector.load %arg13[%c0_41, %c128_42] : memref<8x1024xf32, #tpu.memory_space<vmem>>, vector<8x64xf32>
    tpu.vector_store %arg13[%c0_41, %c128_42], %80 {strides = array<i32>} : memref<8x1024xf32, #tpu.memory_space<vmem>>, vector<8x64xf32>,
    %c3_43 = arith.constant 3 : index
    %c0_44 = arith.constant 0 : index
    %82 = vector.load %arg7[%c3_43, %c0_44] : memref<16x64xf32, #tpu.memory_space<vmem>>, vector<1x64xf32>
    %83 = vector.broadcast %82 : vector<1x64xf32> to vector<8x64xf32>
    %84 = arith.mulf %53, %83 : vector<8x64xf32>
    %85 = math.exp %84 : vector<8x64xf32>
    %c0_45 = arith.constant 0 : index
    %c192 = arith.constant 192 : index
    %86 = vector.load %arg12[%c0_45, %c192] : memref<8x1024xf32, #tpu.memory_space<vmem>>, vector<8x64xf32>
    tpu.vector_store %arg12[%c0_45, %c192], %85 {strides = array<i32>} : memref<8x1024xf32, #tpu.memory_space<vmem>>, vector<8x64xf32>,
    %87 = vector.extract_strided_slice %42 {offsets = [0, 3], sizes = [8, 1], strides = [1, 1]} : vector<8x16xf32> to vector<8x1xf32>
    %88 = vector.broadcast %87 : vector<8x1xf32> to vector<8x64xf32>
    %89 = arith.mulf %88, %54 : vector<8x64xf32>
    %c0_46 = arith.constant 0 : index
    %c192_47 = arith.constant 192 : index
    %90 = vector.load %arg13[%c0_46, %c192_47] : memref<8x1024xf32, #tpu.memory_space<vmem>>, vector<8x64xf32>
    tpu.vector_store %arg13[%c0_46, %c192_47], %89 {strides = array<i32>} : memref<8x1024xf32, #tpu.memory_space<vmem>>, vector<8x64xf32>,
    %c4 = arith.constant 4 : index
    %c0_48 = arith.constant 0 : index
    %91 = vector.load %arg7[%c4, %c0_48] : memref<16x64xf32, #tpu.memory_space<vmem>>, vector<1x64xf32>
    %92 = vector.broadcast %91 : vector<1x64xf32> to vector<8x64xf32>
    %93 = arith.mulf %53, %92 : vector<8x64xf32>
    %94 = math.exp %93 : vector<8x64xf32>
    %c0_49 = arith.constant 0 : index
    %c256 = arith.constant 256 : index
    %95 = vector.load %arg12[%c0_49, %c256] : memref<8x1024xf32, #tpu.memory_space<vmem>>, vector<8x64xf32>
    tpu.vector_store %arg12[%c0_49, %c256], %94 {strides = array<i32>} : memref<8x1024xf32, #tpu.memory_space<vmem>>, vector<8x64xf32>,
    %96 = vector.extract_strided_slice %42 {offsets = [0, 4], sizes = [8, 1], strides = [1, 1]} : vector<8x16xf32> to vector<8x1xf32>
    %97 = vector.broadcast %96 : vector<8x1xf32> to vector<8x64xf32>
    %98 = arith.mulf %97, %54 : vector<8x64xf32>
    %c0_50 = arith.constant 0 : index
    %c256_51 = arith.constant 256 : index
    %99 = vector.load %arg13[%c0_50, %c256_51] : memref<8x1024xf32, #tpu.memory_space<vmem>>, vector<8x64xf32>
    tpu.vector_store %arg13[%c0_50, %c256_51], %98 {strides = array<i32>} : memref<8x1024xf32, #tpu.memory_space<vmem>>, vector<8x64xf32>,
    %c5_52 = arith.constant 5 : index
    %c0_53 = arith.constant 0 : index
    %100 = vector.load %arg7[%c5_52, %c0_53] : memref<16x64xf32, #tpu.memory_space<vmem>>, vector<1x64xf32>
    %101 = vector.broadcast %100 : vector<1x64xf32> to vector<8x64xf32>
    %102 = arith.mulf %53, %101 : vector<8x64xf32>
    %103 = math.exp %102 : vector<8x64xf32>
    %c0_54 = arith.constant 0 : index
    %c320 = arith.constant 320 : index
    %104 = vector.load %arg12[%c0_54, %c320] : memref<8x1024xf32, #tpu.memory_space<vmem>>, vector<8x64xf32>
    tpu.vector_store %arg12[%c0_54, %c320], %103 {strides = array<i32>} : memref<8x1024xf32, #tpu.memory_space<vmem>>, vector<8x64xf32>,
    %105 = vector.extract_strided_slice %42 {offsets = [0, 5], sizes = [8, 1], strides = [1, 1]} : vector<8x16xf32> to vector<8x1xf32>
    %106 = vector.broadcast %105 : vector<8x1xf32> to vector<8x64xf32>
    %107 = arith.mulf %106, %54 : vector<8x64xf32>
    %c0_55 = arith.constant 0 : index
    %c320_56 = arith.constant 320 : index
    %108 = vector.load %arg13[%c0_55, %c320_56] : memref<8x1024xf32, #tpu.memory_space<vmem>>, vector<8x64xf32>
    tpu.vector_store %arg13[%c0_55, %c320_56], %107 {strides = array<i32>} : memref<8x1024xf32, #tpu.memory_space<vmem>>, vector<8x64xf32>,
    %c6_57 = arith.constant 6 : index
    %c0_58 = arith.constant 0 : index
    %109 = vector.load %arg7[%c6_57, %c0_58] : memref<16x64xf32, #tpu.memory_space<vmem>>, vector<1x64xf32>
    %110 = vector.broadcast %109 : vector<1x64xf32> to vector<8x64xf32>
    %111 = arith.mulf %53, %110 : vector<8x64xf32>
    %112 = math.exp %111 : vector<8x64xf32>
    %c0_59 = arith.constant 0 : index
    %c384 = arith.constant 384 : index
    %113 = vector.load %arg12[%c0_59, %c384] : memref<8x1024xf32, #tpu.memory_space<vmem>>, vector<8x64xf32>
    tpu.vector_store %arg12[%c0_59, %c384], %112 {strides = array<i32>} : memref<8x1024xf32, #tpu.memory_space<vmem>>, vector<8x64xf32>,
    %114 = vector.extract_strided_slice %42 {offsets = [0, 6], sizes = [8, 1], strides = [1, 1]} : vector<8x16xf32> to vector<8x1xf32>
    %115 = vector.broadcast %114 : vector<8x1xf32> to vector<8x64xf32>
    %116 = arith.mulf %115, %54 : vector<8x64xf32>
    %c0_60 = arith.constant 0 : index
    %c384_61 = arith.constant 384 : index
    %117 = vector.load %arg13[%c0_60, %c384_61] : memref<8x1024xf32, #tpu.memory_space<vmem>>, vector<8x64xf32>
    tpu.vector_store %arg13[%c0_60, %c384_61], %116 {strides = array<i32>} : memref<8x1024xf32, #tpu.memory_space<vmem>>, vector<8x64xf32>,
    %c7_62 = arith.constant 7 : index
    %c0_63 = arith.constant 0 : index
    %118 = vector.load %arg7[%c7_62, %c0_63] : memref<16x64xf32, #tpu.memory_space<vmem>>, vector<1x64xf32>
    %119 = vector.broadcast %118 : vector<1x64xf32> to vector<8x64xf32>
    %120 = arith.mulf %53, %119 : vector<8x64xf32>
    %121 = math.exp %120 : vector<8x64xf32>
    %c0_64 = arith.constant 0 : index
    %c448 = arith.constant 448 : index
    %122 = vector.load %arg12[%c0_64, %c448] : memref<8x1024xf32, #tpu.memory_space<vmem>>, vector<8x64xf32>
    tpu.vector_store %arg12[%c0_64, %c448], %121 {strides = array<i32>} : memref<8x1024xf32, #tpu.memory_space<vmem>>, vector<8x64xf32>,
    %123 = vector.extract_strided_slice %42 {offsets = [0, 7], sizes = [8, 1], strides = [1, 1]} : vector<8x16xf32> to vector<8x1xf32>
    %124 = vector.broadcast %123 : vector<8x1xf32> to vector<8x64xf32>
    %125 = arith.mulf %124, %54 : vector<8x64xf32>
    %c0_65 = arith.constant 0 : index
    %c448_66 = arith.constant 448 : index
    %126 = vector.load %arg13[%c0_65, %c448_66] : memref<8x1024xf32, #tpu.memory_space<vmem>>, vector<8x64xf32>
    tpu.vector_store %arg13[%c0_65, %c448_66], %125 {strides = array<i32>} : memref<8x1024xf32, #tpu.memory_space<vmem>>, vector<8x64xf32>,
    %c8_67 = arith.constant 8 : index
    %c0_68 = arith.constant 0 : index
    %127 = vector.load %arg7[%c8_67, %c0_68] : memref<16x64xf32, #tpu.memory_space<vmem>>, vector<1x64xf32>
    %128 = vector.broadcast %127 : vector<1x64xf32> to vector<8x64xf32>
    %129 = arith.mulf %53, %128 : vector<8x64xf32>
    %130 = math.exp %129 : vector<8x64xf32>
    %c0_69 = arith.constant 0 : index
    %c512 = arith.constant 512 : index
    %131 = vector.load %arg12[%c0_69, %c512] : memref<8x1024xf32, #tpu.memory_space<vmem>>, vector<8x64xf32>
    tpu.vector_store %arg12[%c0_69, %c512], %130 {strides = array<i32>} : memref<8x1024xf32, #tpu.memory_space<vmem>>, vector<8x64xf32>,
    %132 = vector.extract_strided_slice %42 {offsets = [0, 8], sizes = [8, 1], strides = [1, 1]} : vector<8x16xf32> to vector<8x1xf32>
    %133 = vector.broadcast %132 : vector<8x1xf32> to vector<8x64xf32>
    %134 = arith.mulf %133, %54 : vector<8x64xf32>
    %c0_70 = arith.constant 0 : index
    %c512_71 = arith.constant 512 : index
    %135 = vector.load %arg13[%c0_70, %c512_71] : memref<8x1024xf32, #tpu.memory_space<vmem>>, vector<8x64xf32>
    tpu.vector_store %arg13[%c0_70, %c512_71], %134 {strides = array<i32>} : memref<8x1024xf32, #tpu.memory_space<vmem>>, vector<8x64xf32>,
    %c9 = arith.constant 9 : index
    %c0_72 = arith.constant 0 : index
    %136 = vector.load %arg7[%c9, %c0_72] : memref<16x64xf32, #tpu.memory_space<vmem>>, vector<1x64xf32>
    %137 = vector.broadcast %136 : vector<1x64xf32> to vector<8x64xf32>
    %138 = arith.mulf %53, %137 : vector<8x64xf32>
    %139 = math.exp %138 : vector<8x64xf32>
    %c0_73 = arith.constant 0 : index
    %c576 = arith.constant 576 : index
    %140 = vector.load %arg12[%c0_73, %c576] : memref<8x1024xf32, #tpu.memory_space<vmem>>, vector<8x64xf32>
    tpu.vector_store %arg12[%c0_73, %c576], %139 {strides = array<i32>} : memref<8x1024xf32, #tpu.memory_space<vmem>>, vector<8x64xf32>,
    %141 = vector.extract_strided_slice %42 {offsets = [0, 9], sizes = [8, 1], strides = [1, 1]} : vector<8x16xf32> to vector<8x1xf32>
    %142 = vector.broadcast %141 : vector<8x1xf32> to vector<8x64xf32>
    %143 = arith.mulf %142, %54 : vector<8x64xf32>
    %c0_74 = arith.constant 0 : index
    %c576_75 = arith.constant 576 : index
    %144 = vector.load %arg13[%c0_74, %c576_75] : memref<8x1024xf32, #tpu.memory_space<vmem>>, vector<8x64xf32>
    tpu.vector_store %arg13[%c0_74, %c576_75], %143 {strides = array<i32>} : memref<8x1024xf32, #tpu.memory_space<vmem>>, vector<8x64xf32>,
    %c10 = arith.constant 10 : index
    %c0_76 = arith.constant 0 : index
    %145 = vector.load %arg7[%c10, %c0_76] : memref<16x64xf32, #tpu.memory_space<vmem>>, vector<1x64xf32>
    %146 = vector.broadcast %145 : vector<1x64xf32> to vector<8x64xf32>
    %147 = arith.mulf %53, %146 : vector<8x64xf32>
    %148 = math.exp %147 : vector<8x64xf32>
    %c0_77 = arith.constant 0 : index
    %c640 = arith.constant 640 : index
    %149 = vector.load %arg12[%c0_77, %c640] : memref<8x1024xf32, #tpu.memory_space<vmem>>, vector<8x64xf32>
    tpu.vector_store %arg12[%c0_77, %c640], %148 {strides = array<i32>} : memref<8x1024xf32, #tpu.memory_space<vmem>>, vector<8x64xf32>,
    %150 = vector.extract_strided_slice %42 {offsets = [0, 10], sizes = [8, 1], strides = [1, 1]} : vector<8x16xf32> to vector<8x1xf32>
    %151 = vector.broadcast %150 : vector<8x1xf32> to vector<8x64xf32>
    %152 = arith.mulf %151, %54 : vector<8x64xf32>
    %c0_78 = arith.constant 0 : index
    %c640_79 = arith.constant 640 : index
    %153 = vector.load %arg13[%c0_78, %c640_79] : memref<8x1024xf32, #tpu.memory_space<vmem>>, vector<8x64xf32>
    tpu.vector_store %arg13[%c0_78, %c640_79], %152 {strides = array<i32>} : memref<8x1024xf32, #tpu.memory_space<vmem>>, vector<8x64xf32>,
    %c11 = arith.constant 11 : index
    %c0_80 = arith.constant 0 : index
    %154 = vector.load %arg7[%c11, %c0_80] : memref<16x64xf32, #tpu.memory_space<vmem>>, vector<1x64xf32>
    %155 = vector.broadcast %154 : vector<1x64xf32> to vector<8x64xf32>
    %156 = arith.mulf %53, %155 : vector<8x64xf32>
    %157 = math.exp %156 : vector<8x64xf32>
    %c0_81 = arith.constant 0 : index
    %c704 = arith.constant 704 : index
    %158 = vector.load %arg12[%c0_81, %c704] : memref<8x1024xf32, #tpu.memory_space<vmem>>, vector<8x64xf32>
    tpu.vector_store %arg12[%c0_81, %c704], %157 {strides = array<i32>} : memref<8x1024xf32, #tpu.memory_space<vmem>>, vector<8x64xf32>,
    %159 = vector.extract_strided_slice %42 {offsets = [0, 11], sizes = [8, 1], strides = [1, 1]} : vector<8x16xf32> to vector<8x1xf32>
    %160 = vector.broadcast %159 : vector<8x1xf32> to vector<8x64xf32>
    %161 = arith.mulf %160, %54 : vector<8x64xf32>
    %c0_82 = arith.constant 0 : index
    %c704_83 = arith.constant 704 : index
    %162 = vector.load %arg13[%c0_82, %c704_83] : memref<8x1024xf32, #tpu.memory_space<vmem>>, vector<8x64xf32>
    tpu.vector_store %arg13[%c0_82, %c704_83], %161 {strides = array<i32>} : memref<8x1024xf32, #tpu.memory_space<vmem>>, vector<8x64xf32>,
    %c12 = arith.constant 12 : index
    %c0_84 = arith.constant 0 : index
    %163 = vector.load %arg7[%c12, %c0_84] : memref<16x64xf32, #tpu.memory_space<vmem>>, vector<1x64xf32>
    %164 = vector.broadcast %163 : vector<1x64xf32> to vector<8x64xf32>
    %165 = arith.mulf %53, %164 : vector<8x64xf32>
    %166 = math.exp %165 : vector<8x64xf32>
    %c0_85 = arith.constant 0 : index
    %c768 = arith.constant 768 : index
    %167 = vector.load %arg12[%c0_85, %c768] : memref<8x1024xf32, #tpu.memory_space<vmem>>, vector<8x64xf32>
    tpu.vector_store %arg12[%c0_85, %c768], %166 {strides = array<i32>} : memref<8x1024xf32, #tpu.memory_space<vmem>>, vector<8x64xf32>,
    %168 = vector.extract_strided_slice %42 {offsets = [0, 12], sizes = [8, 1], strides = [1, 1]} : vector<8x16xf32> to vector<8x1xf32>
    %169 = vector.broadcast %168 : vector<8x1xf32> to vector<8x64xf32>
    %170 = arith.mulf %169, %54 : vector<8x64xf32>
    %c0_86 = arith.constant 0 : index
    %c768_87 = arith.constant 768 : index
    %171 = vector.load %arg13[%c0_86, %c768_87] : memref<8x1024xf32, #tpu.memory_space<vmem>>, vector<8x64xf32>
    tpu.vector_store %arg13[%c0_86, %c768_87], %170 {strides = array<i32>} : memref<8x1024xf32, #tpu.memory_space<vmem>>, vector<8x64xf32>,
    %c13 = arith.constant 13 : index
    %c0_88 = arith.constant 0 : index
    %172 = vector.load %arg7[%c13, %c0_88] : memref<16x64xf32, #tpu.memory_space<vmem>>, vector<1x64xf32>
    %173 = vector.broadcast %172 : vector<1x64xf32> to vector<8x64xf32>
    %174 = arith.mulf %53, %173 : vector<8x64xf32>
    %175 = math.exp %174 : vector<8x64xf32>
    %c0_89 = arith.constant 0 : index
    %c832 = arith.constant 832 : index
    %176 = vector.load %arg12[%c0_89, %c832] : memref<8x1024xf32, #tpu.memory_space<vmem>>, vector<8x64xf32>
    tpu.vector_store %arg12[%c0_89, %c832], %175 {strides = array<i32>} : memref<8x1024xf32, #tpu.memory_space<vmem>>, vector<8x64xf32>,
    %177 = vector.extract_strided_slice %42 {offsets = [0, 13], sizes = [8, 1], strides = [1, 1]} : vector<8x16xf32> to vector<8x1xf32>
    %178 = vector.broadcast %177 : vector<8x1xf32> to vector<8x64xf32>
    %179 = arith.mulf %178, %54 : vector<8x64xf32>
    %c0_90 = arith.constant 0 : index
    %c832_91 = arith.constant 832 : index
    %180 = vector.load %arg13[%c0_90, %c832_91] : memref<8x1024xf32, #tpu.memory_space<vmem>>, vector<8x64xf32>
    tpu.vector_store %arg13[%c0_90, %c832_91], %179 {strides = array<i32>} : memref<8x1024xf32, #tpu.memory_space<vmem>>, vector<8x64xf32>,
    %c14 = arith.constant 14 : index
    %c0_92 = arith.constant 0 : index
    %181 = vector.load %arg7[%c14, %c0_92] : memref<16x64xf32, #tpu.memory_space<vmem>>, vector<1x64xf32>
    %182 = vector.broadcast %181 : vector<1x64xf32> to vector<8x64xf32>
    %183 = arith.mulf %53, %182 : vector<8x64xf32>
    %184 = math.exp %183 : vector<8x64xf32>
    %c0_93 = arith.constant 0 : index
    %c896 = arith.constant 896 : index
    %185 = vector.load %arg12[%c0_93, %c896] : memref<8x1024xf32, #tpu.memory_space<vmem>>, vector<8x64xf32>
    tpu.vector_store %arg12[%c0_93, %c896], %184 {strides = array<i32>} : memref<8x1024xf32, #tpu.memory_space<vmem>>, vector<8x64xf32>,
    %186 = vector.extract_strided_slice %42 {offsets = [0, 14], sizes = [8, 1], strides = [1, 1]} : vector<8x16xf32> to vector<8x1xf32>
    %187 = vector.broadcast %186 : vector<8x1xf32> to vector<8x64xf32>
    %188 = arith.mulf %187, %54 : vector<8x64xf32>
    %c0_94 = arith.constant 0 : index
    %c896_95 = arith.constant 896 : index
    %189 = vector.load %arg13[%c0_94, %c896_95] : memref<8x1024xf32, #tpu.memory_space<vmem>>, vector<8x64xf32>
    tpu.vector_store %arg13[%c0_94, %c896_95], %188 {strides = array<i32>} : memref<8x1024xf32, #tpu.memory_space<vmem>>, vector<8x64xf32>,
    %c15 = arith.constant 15 : index
    %c0_96 = arith.constant 0 : index
    %190 = vector.load %arg7[%c15, %c0_96] : memref<16x64xf32, #tpu.memory_space<vmem>>, vector<1x64xf32>
    %191 = vector.broadcast %190 : vector<1x64xf32> to vector<8x64xf32>
    %192 = arith.mulf %53, %191 : vector<8x64xf32>
    %193 = math.exp %192 : vector<8x64xf32>
    %c0_97 = arith.constant 0 : index
    %c960 = arith.constant 960 : index
    %194 = vector.load %arg12[%c0_97, %c960] : memref<8x1024xf32, #tpu.memory_space<vmem>>, vector<8x64xf32>
    tpu.vector_store %arg12[%c0_97, %c960], %193 {strides = array<i32>} : memref<8x1024xf32, #tpu.memory_space<vmem>>, vector<8x64xf32>,
    %195 = vector.extract_strided_slice %42 {offsets = [0, 15], sizes = [8, 1], strides = [1, 1]} : vector<8x16xf32> to vector<8x1xf32>
    %196 = vector.broadcast %195 : vector<8x1xf32> to vector<8x64xf32>
    %197 = arith.mulf %196, %54 : vector<8x64xf32>
    %c0_98 = arith.constant 0 : index
    %c960_99 = arith.constant 960 : index
    %198 = vector.load %arg13[%c0_98, %c960_99] : memref<8x1024xf32, #tpu.memory_space<vmem>>, vector<8x64xf32>
    tpu.vector_store %arg13[%c0_98, %c960_99], %197 {strides = array<i32>} : memref<8x1024xf32, #tpu.memory_space<vmem>>, vector<8x64xf32>,
    %cst_100 = arith.constant 0.000000e+00 : f32
    %199 = vector.broadcast %cst_100 : f32 to vector<1x1024xf32>
    %c0_i32 = arith.constant 0 : i32
    %c1_i32 = arith.constant 1 : i32
    %200 = arith.muli %c0_i32, %c1_i32 : i32
    %201 = arith.index_cast %200 : i32 to index
    %c0_101 = arith.constant 0 : index
    %202 = vector.load %arg12[%201, %c0_101] : memref<8x1024xf32, #tpu.memory_space<vmem>>, vector<1x1024xf32>
    %203 = arith.index_cast %200 : i32 to index
    %c0_102 = arith.constant 0 : index
    %204 = vector.load %arg13[%203, %c0_102] : memref<8x1024xf32, #tpu.memory_space<vmem>>, vector<1x1024xf32>
    %205 = arith.mulf %202, %199 : vector<1x1024xf32>
    %206 = arith.addf %205, %204 : vector<1x1024xf32>
    %207 = arith.index_cast %200 : i32 to index
    %c0_103 = arith.constant 0 : index
    %208 = vector.load %arg14[%207, %c0_103] : memref<8x1024xf32, #tpu.memory_space<vmem>>, vector<1x1024xf32>
    tpu.vector_store %arg14[%207, %c0_103], %206 {strides = array<i32>} : memref<8x1024xf32, #tpu.memory_space<vmem>>, vector<1x1024xf32>,
    %c1_i32_104 = arith.constant 1 : i32
    %c1_i32_105 = arith.constant 1 : i32
    %209 = arith.muli %c1_i32_104, %c1_i32_105 : i32
    %210 = arith.index_cast %209 : i32 to index
    %c0_106 = arith.constant 0 : index
    %211 = vector.load %arg12[%210, %c0_106] : memref<8x1024xf32, #tpu.memory_space<vmem>>, vector<1x1024xf32>
    %212 = arith.index_cast %209 : i32 to index
    %c0_107 = arith.constant 0 : index
    %213 = vector.load %arg13[%212, %c0_107] : memref<8x1024xf32, #tpu.memory_space<vmem>>, vector<1x1024xf32>
    %214 = arith.mulf %211, %206 : vector<1x1024xf32>
    %215 = arith.addf %214, %213 : vector<1x1024xf32>
    %216 = arith.index_cast %209 : i32 to index
    %c0_108 = arith.constant 0 : index
    %217 = vector.load %arg14[%216, %c0_108] : memref<8x1024xf32, #tpu.memory_space<vmem>>, vector<1x1024xf32>
    tpu.vector_store %arg14[%216, %c0_108], %215 {strides = array<i32>} : memref<8x1024xf32, #tpu.memory_space<vmem>>, vector<1x1024xf32>,
    %c2_i32 = arith.constant 2 : i32
    %c1_i32_109 = arith.constant 1 : i32
    %218 = arith.muli %c2_i32, %c1_i32_109 : i32
    %219 = arith.index_cast %218 : i32 to index
    %c0_110 = arith.constant 0 : index
    %220 = vector.load %arg12[%219, %c0_110] : memref<8x1024xf32, #tpu.memory_space<vmem>>, vector<1x1024xf32>
    %221 = arith.index_cast %218 : i32 to index
    %c0_111 = arith.constant 0 : index
    %222 = vector.load %arg13[%221, %c0_111] : memref<8x1024xf32, #tpu.memory_space<vmem>>, vector<1x1024xf32>
    %223 = arith.mulf %220, %215 : vector<1x1024xf32>
    %224 = arith.addf %223, %222 : vector<1x1024xf32>
    %225 = arith.index_cast %218 : i32 to index
    %c0_112 = arith.constant 0 : index
    %226 = vector.load %arg14[%225, %c0_112] : memref<8x1024xf32, #tpu.memory_space<vmem>>, vector<1x1024xf32>
    tpu.vector_store %arg14[%225, %c0_112], %224 {strides = array<i32>} : memref<8x1024xf32, #tpu.memory_space<vmem>>, vector<1x1024xf32>,
    %c3_i32 = arith.constant 3 : i32
    %c1_i32_113 = arith.constant 1 : i32
    %227 = arith.muli %c3_i32, %c1_i32_113 : i32
    %228 = arith.index_cast %227 : i32 to index
    %c0_114 = arith.constant 0 : index
    %229 = vector.load %arg12[%228, %c0_114] : memref<8x1024xf32, #tpu.memory_space<vmem>>, vector<1x1024xf32>
    %230 = arith.index_cast %227 : i32 to index
    %c0_115 = arith.constant 0 : index
    %231 = vector.load %arg13[%230, %c0_115] : memref<8x1024xf32, #tpu.memory_space<vmem>>, vector<1x1024xf32>
    %232 = arith.mulf %229, %224 : vector<1x1024xf32>
    %233 = arith.addf %232, %231 : vector<1x1024xf32>
    %234 = arith.index_cast %227 : i32 to index
    %c0_116 = arith.constant 0 : index
    %235 = vector.load %arg14[%234, %c0_116] : memref<8x1024xf32, #tpu.memory_space<vmem>>, vector<1x1024xf32>
    tpu.vector_store %arg14[%234, %c0_116], %233 {strides = array<i32>} : memref<8x1024xf32, #tpu.memory_space<vmem>>, vector<1x1024xf32>,
    %c4_i32 = arith.constant 4 : i32
    %c1_i32_117 = arith.constant 1 : i32
    %236 = arith.muli %c4_i32, %c1_i32_117 : i32
    %237 = arith.index_cast %236 : i32 to index
    %c0_118 = arith.constant 0 : index
    %238 = vector.load %arg12[%237, %c0_118] : memref<8x1024xf32, #tpu.memory_space<vmem>>, vector<1x1024xf32>
    %239 = arith.index_cast %236 : i32 to index
    %c0_119 = arith.constant 0 : index
    %240 = vector.load %arg13[%239, %c0_119] : memref<8x1024xf32, #tpu.memory_space<vmem>>, vector<1x1024xf32>
    %241 = arith.mulf %238, %233 : vector<1x1024xf32>
    %242 = arith.addf %241, %240 : vector<1x1024xf32>
    %243 = arith.index_cast %236 : i32 to index
    %c0_120 = arith.constant 0 : index
    %244 = vector.load %arg14[%243, %c0_120] : memref<8x1024xf32, #tpu.memory_space<vmem>>, vector<1x1024xf32>
    tpu.vector_store %arg14[%243, %c0_120], %242 {strides = array<i32>} : memref<8x1024xf32, #tpu.memory_space<vmem>>, vector<1x1024xf32>,
    %c5_i32 = arith.constant 5 : i32
    %c1_i32_121 = arith.constant 1 : i32
    %245 = arith.muli %c5_i32, %c1_i32_121 : i32
    %246 = arith.index_cast %245 : i32 to index
    %c0_122 = arith.constant 0 : index
    %247 = vector.load %arg12[%246, %c0_122] : memref<8x1024xf32, #tpu.memory_space<vmem>>, vector<1x1024xf32>
    %248 = arith.index_cast %245 : i32 to index
    %c0_123 = arith.constant 0 : index
    %249 = vector.load %arg13[%248, %c0_123] : memref<8x1024xf32, #tpu.memory_space<vmem>>, vector<1x1024xf32>
    %250 = arith.mulf %247, %242 : vector<1x1024xf32>
    %251 = arith.addf %250, %249 : vector<1x1024xf32>
    %252 = arith.index_cast %245 : i32 to index
    %c0_124 = arith.constant 0 : index
    %253 = vector.load %arg14[%252, %c0_124] : memref<8x1024xf32, #tpu.memory_space<vmem>>, vector<1x1024xf32>
    tpu.vector_store %arg14[%252, %c0_124], %251 {strides = array<i32>} : memref<8x1024xf32, #tpu.memory_space<vmem>>, vector<1x1024xf32>,
    %c6_i32 = arith.constant 6 : i32
    %c1_i32_125 = arith.constant 1 : i32
    %254 = arith.muli %c6_i32, %c1_i32_125 : i32
    %255 = arith.index_cast %254 : i32 to index
    %c0_126 = arith.constant 0 : index
    %256 = vector.load %arg12[%255, %c0_126] : memref<8x1024xf32, #tpu.memory_space<vmem>>, vector<1x1024xf32>
    %257 = arith.index_cast %254 : i32 to index
    %c0_127 = arith.constant 0 : index
    %258 = vector.load %arg13[%257, %c0_127] : memref<8x1024xf32, #tpu.memory_space<vmem>>, vector<1x1024xf32>
    %259 = arith.mulf %256, %251 : vector<1x1024xf32>
    %260 = arith.addf %259, %258 : vector<1x1024xf32>
    %261 = arith.index_cast %254 : i32 to index
    %c0_128 = arith.constant 0 : index
    %262 = vector.load %arg14[%261, %c0_128] : memref<8x1024xf32, #tpu.memory_space<vmem>>, vector<1x1024xf32>
    tpu.vector_store %arg14[%261, %c0_128], %260 {strides = array<i32>} : memref<8x1024xf32, #tpu.memory_space<vmem>>, vector<1x1024xf32>,
    %c7_i32 = arith.constant 7 : i32
    %c1_i32_129 = arith.constant 1 : i32
    %263 = arith.muli %c7_i32, %c1_i32_129 : i32
    %264 = arith.index_cast %263 : i32 to index
    %c0_130 = arith.constant 0 : index
    %265 = vector.load %arg12[%264, %c0_130] : memref<8x1024xf32, #tpu.memory_space<vmem>>, vector<1x1024xf32>
    %266 = arith.index_cast %263 : i32 to index
    %c0_131 = arith.constant 0 : index
    %267 = vector.load %arg13[%266, %c0_131] : memref<8x1024xf32, #tpu.memory_space<vmem>>, vector<1x1024xf32>
    %268 = arith.mulf %265, %260 : vector<1x1024xf32>
    %269 = arith.addf %268, %267 : vector<1x1024xf32>
    %270 = arith.index_cast %263 : i32 to index
    %c0_132 = arith.constant 0 : index
    %271 = vector.load %arg14[%270, %c0_132] : memref<8x1024xf32, #tpu.memory_space<vmem>>, vector<1x1024xf32>
    tpu.vector_store %arg14[%270, %c0_132], %269 {strides = array<i32>} : memref<8x1024xf32, #tpu.memory_space<vmem>>, vector<1x1024xf32>,
    %c8_i32 = arith.constant 8 : i32
    %272 = vector.extract_strided_slice %43 {offsets = [0, 0], sizes = [8, 1], strides = [1, 1]} : vector<8x16xf32> to vector<8x1xf32>
    %c0_133 = arith.constant 0 : index
    %c0_134 = arith.constant 0 : index
    %273 = vector.load %arg14[%c0_133, %c0_134] : memref<8x1024xf32, #tpu.memory_space<vmem>>, vector<8x64xf32>
    %274 = vector.broadcast %272 : vector<8x1xf32> to vector<8x64xf32>
    %275 = arith.mulf %274, %273 : vector<8x64xf32>
    %276 = vector.extract_strided_slice %43 {offsets = [0, 1], sizes = [8, 1], strides = [1, 1]} : vector<8x16xf32> to vector<8x1xf32>
    %c0_135 = arith.constant 0 : index
    %c64_136 = arith.constant 64 : index
    %277 = vector.load %arg14[%c0_135, %c64_136] : memref<8x1024xf32, #tpu.memory_space<vmem>>, vector<8x64xf32>
    %278 = vector.broadcast %276 : vector<8x1xf32> to vector<8x64xf32>
    %279 = arith.mulf %278, %277 : vector<8x64xf32>
    %280 = arith.addf %275, %279 : vector<8x64xf32>
    %281 = vector.extract_strided_slice %43 {offsets = [0, 2], sizes = [8, 1], strides = [1, 1]} : vector<8x16xf32> to vector<8x1xf32>
    %c0_137 = arith.constant 0 : index
    %c128_138 = arith.constant 128 : index
    %282 = vector.load %arg14[%c0_137, %c128_138] : memref<8x1024xf32, #tpu.memory_space<vmem>>, vector<8x64xf32>
    %283 = vector.broadcast %281 : vector<8x1xf32> to vector<8x64xf32>
    %284 = arith.mulf %283, %282 : vector<8x64xf32>
    %285 = arith.addf %280, %284 : vector<8x64xf32>
    %286 = vector.extract_strided_slice %43 {offsets = [0, 3], sizes = [8, 1], strides = [1, 1]} : vector<8x16xf32> to vector<8x1xf32>
    %c0_139 = arith.constant 0 : index
    %c192_140 = arith.constant 192 : index
    %287 = vector.load %arg14[%c0_139, %c192_140] : memref<8x1024xf32, #tpu.memory_space<vmem>>, vector<8x64xf32>
    %288 = vector.broadcast %286 : vector<8x1xf32> to vector<8x64xf32>
    %289 = arith.mulf %288, %287 : vector<8x64xf32>
    %290 = arith.addf %285, %289 : vector<8x64xf32>
    %291 = vector.extract_strided_slice %43 {offsets = [0, 4], sizes = [8, 1], strides = [1, 1]} : vector<8x16xf32> to vector<8x1xf32>
    %c0_141 = arith.constant 0 : index
    %c256_142 = arith.constant 256 : index
    %292 = vector.load %arg14[%c0_141, %c256_142] : memref<8x1024xf32, #tpu.memory_space<vmem>>, vector<8x64xf32>
    %293 = vector.broadcast %291 : vector<8x1xf32> to vector<8x64xf32>
    %294 = arith.mulf %293, %292 : vector<8x64xf32>
    %295 = arith.addf %290, %294 : vector<8x64xf32>
    %296 = vector.extract_strided_slice %43 {offsets = [0, 5], sizes = [8, 1], strides = [1, 1]} : vector<8x16xf32> to vector<8x1xf32>
    %c0_143 = arith.constant 0 : index
    %c320_144 = arith.constant 320 : index
    %297 = vector.load %arg14[%c0_143, %c320_144] : memref<8x1024xf32, #tpu.memory_space<vmem>>, vector<8x64xf32>
    %298 = vector.broadcast %296 : vector<8x1xf32> to vector<8x64xf32>
    %299 = arith.mulf %298, %297 : vector<8x64xf32>
    %300 = arith.addf %295, %299 : vector<8x64xf32>
    %301 = vector.extract_strided_slice %43 {offsets = [0, 6], sizes = [8, 1], strides = [1, 1]} : vector<8x16xf32> to vector<8x1xf32>
    %c0_145 = arith.constant 0 : index
    %c384_146 = arith.constant 384 : index
    %302 = vector.load %arg14[%c0_145, %c384_146] : memref<8x1024xf32, #tpu.memory_space<vmem>>, vector<8x64xf32>
    %303 = vector.broadcast %301 : vector<8x1xf32> to vector<8x64xf32>
    %304 = arith.mulf %303, %302 : vector<8x64xf32>
    %305 = arith.addf %300, %304 : vector<8x64xf32>
    %306 = vector.extract_strided_slice %43 {offsets = [0, 7], sizes = [8, 1], strides = [1, 1]} : vector<8x16xf32> to vector<8x1xf32>
    %c0_147 = arith.constant 0 : index
    %c448_148 = arith.constant 448 : index
    %307 = vector.load %arg14[%c0_147, %c448_148] : memref<8x1024xf32, #tpu.memory_space<vmem>>, vector<8x64xf32>
    %308 = vector.broadcast %306 : vector<8x1xf32> to vector<8x64xf32>
    %309 = arith.mulf %308, %307 : vector<8x64xf32>
    %310 = arith.addf %305, %309 : vector<8x64xf32>
    %311 = vector.extract_strided_slice %43 {offsets = [0, 8], sizes = [8, 1], strides = [1, 1]} : vector<8x16xf32> to vector<8x1xf32>
    %c0_149 = arith.constant 0 : index
    %c512_150 = arith.constant 512 : index
    %312 = vector.load %arg14[%c0_149, %c512_150] : memref<8x1024xf32, #tpu.memory_space<vmem>>, vector<8x64xf32>
    %313 = vector.broadcast %311 : vector<8x1xf32> to vector<8x64xf32>
    %314 = arith.mulf %313, %312 : vector<8x64xf32>
    %315 = arith.addf %310, %314 : vector<8x64xf32>
    %316 = vector.extract_strided_slice %43 {offsets = [0, 9], sizes = [8, 1], strides = [1, 1]} : vector<8x16xf32> to vector<8x1xf32>
    %c0_151 = arith.constant 0 : index
    %c576_152 = arith.constant 576 : index
    %317 = vector.load %arg14[%c0_151, %c576_152] : memref<8x1024xf32, #tpu.memory_space<vmem>>, vector<8x64xf32>
    %318 = vector.broadcast %316 : vector<8x1xf32> to vector<8x64xf32>
    %319 = arith.mulf %318, %317 : vector<8x64xf32>
    %320 = arith.addf %315, %319 : vector<8x64xf32>
    %321 = vector.extract_strided_slice %43 {offsets = [0, 10], sizes = [8, 1], strides = [1, 1]} : vector<8x16xf32> to vector<8x1xf32>
    %c0_153 = arith.constant 0 : index
    %c640_154 = arith.constant 640 : index
    %322 = vector.load %arg14[%c0_153, %c640_154] : memref<8x1024xf32, #tpu.memory_space<vmem>>, vector<8x64xf32>
    %323 = vector.broadcast %321 : vector<8x1xf32> to vector<8x64xf32>
    %324 = arith.mulf %323, %322 : vector<8x64xf32>
    %325 = arith.addf %320, %324 : vector<8x64xf32>
    %326 = vector.extract_strided_slice %43 {offsets = [0, 11], sizes = [8, 1], strides = [1, 1]} : vector<8x16xf32> to vector<8x1xf32>
    %c0_155 = arith.constant 0 : index
    %c704_156 = arith.constant 704 : index
    %327 = vector.load %arg14[%c0_155, %c704_156] : memref<8x1024xf32, #tpu.memory_space<vmem>>, vector<8x64xf32>
    %328 = vector.broadcast %326 : vector<8x1xf32> to vector<8x64xf32>
    %329 = arith.mulf %328, %327 : vector<8x64xf32>
    %330 = arith.addf %325, %329 : vector<8x64xf32>
    %331 = vector.extract_strided_slice %43 {offsets = [0, 12], sizes = [8, 1], strides = [1, 1]} : vector<8x16xf32> to vector<8x1xf32>
    %c0_157 = arith.constant 0 : index
    %c768_158 = arith.constant 768 : index
    %332 = vector.load %arg14[%c0_157, %c768_158] : memref<8x1024xf32, #tpu.memory_space<vmem>>, vector<8x64xf32>
    %333 = vector.broadcast %331 : vector<8x1xf32> to vector<8x64xf32>
    %334 = arith.mulf %333, %332 : vector<8x64xf32>
    %335 = arith.addf %330, %334 : vector<8x64xf32>
    %336 = vector.extract_strided_slice %43 {offsets = [0, 13], sizes = [8, 1], strides = [1, 1]} : vector<8x16xf32> to vector<8x1xf32>
    %c0_159 = arith.constant 0 : index
    %c832_160 = arith.constant 832 : index
    %337 = vector.load %arg14[%c0_159, %c832_160] : memref<8x1024xf32, #tpu.memory_space<vmem>>, vector<8x64xf32>
    %338 = vector.broadcast %336 : vector<8x1xf32> to vector<8x64xf32>
    %339 = arith.mulf %338, %337 : vector<8x64xf32>
    %340 = arith.addf %335, %339 : vector<8x64xf32>
    %341 = vector.extract_strided_slice %43 {offsets = [0, 14], sizes = [8, 1], strides = [1, 1]} : vector<8x16xf32> to vector<8x1xf32>
    %c0_161 = arith.constant 0 : index
    %c896_162 = arith.constant 896 : index
    %342 = vector.load %arg14[%c0_161, %c896_162] : memref<8x1024xf32, #tpu.memory_space<vmem>>, vector<8x64xf32>
    %343 = vector.broadcast %341 : vector<8x1xf32> to vector<8x64xf32>
    %344 = arith.mulf %343, %342 : vector<8x64xf32>
    %345 = arith.addf %340, %344 : vector<8x64xf32>
    %346 = vector.extract_strided_slice %43 {offsets = [0, 15], sizes = [8, 1], strides = [1, 1]} : vector<8x16xf32> to vector<8x1xf32>
    %c0_163 = arith.constant 0 : index
    %c960_164 = arith.constant 960 : index
    %347 = vector.load %arg14[%c0_163, %c960_164] : memref<8x1024xf32, #tpu.memory_space<vmem>>, vector<8x64xf32>
    %348 = vector.broadcast %346 : vector<8x1xf32> to vector<8x64xf32>
    %349 = arith.mulf %348, %347 : vector<8x64xf32>
    %350 = arith.addf %345, %349 : vector<8x64xf32>
    %c0_165 = arith.constant 0 : index
    %c0_166 = arith.constant 0 : index
    %351 = vector.load %arg8[%c0_165, %c0_166] : memref<1x64xf32, #tpu.memory_space<vmem>>, vector<1x64xf32>
    %352 = vector.broadcast %351 : vector<1x64xf32> to vector<8x64xf32>
    %353 = arith.mulf %35, %352 : vector<8x64xf32>
    %354 = arith.addf %350, %353 : vector<8x64xf32>
    %355 = arith.negf %5 : vector<8x64xf32>
    %356 = math.exp %355 : vector<8x64xf32>
    %cst_167 = arith.constant 1.000000e+00 : f32
    %357 = vector.broadcast %cst_167 : f32 to vector<8x64xf32>
    %358 = arith.addf %357, %356 : vector<8x64xf32>
    %359 = arith.divf %357, %358 : vector<8x64xf32>
    %360 = arith.mulf %5, %359 : vector<8x64xf32>
    %361 = arith.mulf %354, %360 : vector<8x64xf32>
    %c0_168 = arith.constant 0 : index
    %c0_169 = arith.constant 0 : index
    %362 = vector.load %arg9[%c0_168, %c0_169] : memref<64x32xf32, #tpu.memory_space<vmem>>, vector<64x32xf32>
    %cst_170 = arith.constant dense<0.000000e+00> : vector<8x32xf32>
    %363 = tpu.matmul %361, %362, %cst_170 {dimension_numbers = #tpu.dot_dimension_numbers<[1], [0], [0], [1], [0, 0, 1, 1], [], []>} : vector<8x64xf32>, vector<64x32xf32>, vector<8x32xf32> -> vector<8x32xf32>
    %c0_171 = arith.constant 0 : index
    %c0_172 = arith.constant 0 : index
    %c0_173 = arith.constant 0 : index
    %364 = vector.load %arg10[%c0_171, %c0_172, %c0_173] : memref<1x8x32xf32, #tpu.memory_space<vmem>>, vector<1x8x32xf32>
    %365 = vector.shape_cast %364 : vector<1x8x32xf32> to vector<8x32xf32>
    %366 = vector.shape_cast %363 : vector<8x32xf32> to vector<1x8x32xf32>
    tpu.vector_store %arg10[%c0_171, %c0_172, %c0_173], %366 {strides = array<i32>} : memref<1x8x32xf32, #tpu.memory_space<vmem>>, vector<1x8x32xf32>,
    return
  }
  func.func @transform_0(%arg0: i32) -> (i32, i32, i32) {
    %c0_i32 = arith.constant 0 : i32
    %c0_i32_0 = arith.constant 0 : i32
    %c0_i32_1 = arith.constant 0 : i32
    return %arg0, %c0_i32, %c0_i32_0 : i32, i32, i32
  }
  func.func @transform_1(%arg0: i32) -> (i32, i32) {
    %c0_i32 = arith.constant 0 : i32
    %c0_i32_0 = arith.constant 0 : i32
    %c0_i32_1 = arith.constant 0 : i32
    return %c0_i32, %c0_i32_0 : i32, i32
  }
  func.func @transform_2(%arg0: i32) -> (i32, i32) {
    %c0_i32 = arith.constant 0 : i32
    %c0_i32_0 = arith.constant 0 : i32
    %c0_i32_1 = arith.constant 0 : i32
    return %c0_i32, %c0_i32_0 : i32, i32
  }
  func.func @transform_3(%arg0: i32) -> (i32, i32) {
    %c0_i32 = arith.constant 0 : i32
    %c0_i32_0 = arith.constant 0 : i32
    %c0_i32_1 = arith.constant 0 : i32
    return %c0_i32, %c0_i32_0 : i32, i32
  }
  func.func @transform_4(%arg0: i32) -> (i32, i32) {
    %c0_i32 = arith.constant 0 : i32
    %c0_i32_0 = arith.constant 0 : i32
    %c0_i32_1 = arith.constant 0 : i32
    return %c0_i32, %c0_i32_0 : i32, i32
  }
  func.func @transform_5(%arg0: i32) -> (i32, i32) {
    %c0_i32 = arith.constant 0 : i32
    %c0_i32_0 = arith.constant 0 : i32
    %c0_i32_1 = arith.constant 0 : i32
    return %c0_i32, %c0_i32_0 : i32, i32
  }
  func.func @transform_6(%arg0: i32) -> (i32, i32) {
    %c0_i32 = arith.constant 0 : i32
    %c0_i32_0 = arith.constant 0 : i32
    %c0_i32_1 = arith.constant 0 : i32
    return %c0_i32, %c0_i32_0 : i32, i32
  }
  func.func @transform_7(%arg0: i32) -> (i32, i32) {
    %c0_i32 = arith.constant 0 : i32
    %c0_i32_0 = arith.constant 0 : i32
    %c0_i32_1 = arith.constant 0 : i32
    return %c0_i32, %c0_i32_0 : i32, i32
  }
  func.func @transform_8(%arg0: i32) -> (i32, i32) {
    %c0_i32 = arith.constant 0 : i32
    %c0_i32_0 = arith.constant 0 : i32
    %c0_i32_1 = arith.constant 0 : i32
    return %c0_i32, %c0_i32_0 : i32, i32
  }
  func.func @transform_9(%arg0: i32) -> (i32, i32, i32) {
    %c0_i32 = arith.constant 0 : i32
    %c0_i32_0 = arith.constant 0 : i32
    %c0_i32_1 = arith.constant 0 : i32
    return %arg0, %c0_i32, %c0_i32_0 : i32, i32, i32
  }
}

</mosaic_0001>

<bundles_post_ra>
// kernel: tpu_custom_call.1
= control target key start
LH: loop header
LB: loop body
LE: loop exit
PB: predicated region body
PF: predicated region fallthrough
CT: control target
= control target key end

     0   :  { %s2279_s0 = inlined_call_operand.hbm [shape: f32[2,8,32], index: 0, kind: input, shape index: {}]   ;;  %s2280_s1 = inlined_call_operand.vmem [shape: f32[32,128], index: 1, kind: input, shape index: {}]   ;;  %s2281_s2 = inlined_call_operand.vmem [shape: f32[4,64], index: 2, kind: input, shape index: {}]   ;;  %s2282_s3 = inlined_call_operand.vmem [shape: f32[1,64], index: 3, kind: input, shape index: {}]   ;;  %s2283_s4 = inlined_call_operand.vmem [shape: f32[64,96], index: 4, kind: input, shape index: {}]   ;;  %s2284_s5 = inlined_call_operand.vmem [shape: f32[1,64], index: 5, kind: input, shape index: {}]   ;;  %s2285_s6 = inlined_call_operand.hbm [shape: f32[16,64], index: 6, kind: input, shape index: {}]   ;;  %s2286_s7 = inlined_call_operand.vmem [shape: f32[1,64], index: 7, kind: input, shape index: {}]   ;;  %s2287_s8 = inlined_call_operand.vmem [shape: f32[64,32], index: 8, kind: input, shape index: {}]   ;;  %s2288_s9 = inlined_call_operand.hbm [shape: f32[2,8,32], index: 9, kind: output, shape index: {}]  }
   0x1   :  { %2296 = sst [smem:[#allocation18_spill]] %s2285_s6 }
   0x2   :  { %14 = vsyncpa [#allocation7], 0 }
   0x3   :  { %16 = vsyncpa [#allocation7 + $0x1], 0 }
   0x4   :  { %17 = vsyncpa [#allocation10], 0 }
   0x5   :  { %18 = vsyncpa [#allocation8], 0 }
   0x6   :  { %20 = vsyncpa [#allocation8 + $0x1], 0  ;;  %s1827_s30 = smov 0   ;;  %s1829_s10 = smov 0  }
   0x7   :  { %s1831_s11 = smov 0   ;;  %s1833_s12 = smov 0  }
   0x8 LB: > { %s1848_s13 = sadd.s32 4294967295, %s1735_s12   ;;  %s1328_s14 = sadd.s32 4294967294, %s1735_s12   ;;  %s1735_s12 = sphi %s1833_s12, %s2316_s12   ;;  %s1731_s11 = sphi %s1831_s11, %s2320_s11   ;;  %s1727_s10 = sphi %s1829_s10, %s2319_s10   ;;  %s1723_s30 = sphi %s1827_s30, %s2318_s30  }
   0x9   : > { %p46_p0 = scmp.ne.s32.totalorder %s1727_s10, %s1723_s30  ;;  %p2292_p1 = scmp.eq.s32.totalorder %s1848_s13, 0 }
   0xa   : > { %p244_p3 = scmp.eq.s32.totalorder %s1328_s14, 1  ;;  %p1329_p5 = scmp.ge.s32.totalorder %s1735_s12, 1 }
   0xb   : > { %p1857_p4 = por %p2292_p1, %p46_p0  ;;  %p251_p7 = scmp.lt.s32.totalorder %s1735_s12, 3 }
   0xc   : > { %p1862_p6 = por %p244_p3, %p46_p0  ;;  %s1737_s18 = smov [#allocation9]  }
   0xd   : > { %s2297_s15 = scalar_select %p1857_p4, 1, 0 }
   0xe   : > { %s2298_s16 = scalar_select %p1862_p6, 1, 0 }
   0xf   : > { %p1867_p8 = pnand %p1329_p5, %p251_p7  ;;  %s278_s19 = sshll.u32 %s1737_s18, 4  ;;  %s279_s19 = int_to_ptr.vmem [resolvable:$true] %s278_s19 }
  0x10   : > { %2299 = sst [smem:[#allocation15_spill]] %s2298_s16  ;;  %s1881_s21 = sadd.s32 1, %s1735_s12  }
  0x11   : > { %s2300_s17 = scalar_select %p1867_p8, 1, 0 }
  0x12   : > { %p1450_p9 = pneg %p1867_p8  ;;  %2302 = sst [smem:[#allocation16_spill]] %s1881_s21 }
  0x13   : > { %s33_s22 = sadd.s32 1, %s1731_s11  ;;  %s30_s23 = ssub.s32 %s1735_s12, %s1881_s21 }
  0x14   : > { %p1876_p11 = pnand %p1450_p9, %p2292_p1  ;;  %s1624_s24 = scalar_lea.vmem %s279_s19, 256 }
  0x15   : > { %p1625_p13 = scmp.ne.s32.totalorder %s279_s19, %s1624_s24  ;;  %p1632_p5 = scmp.lt.s32.totalorder %s279_s19, %s279_s19 }
  0x16   : > { %p1615_p12 = pneg %p1876_p11  ;;  %p1633_p7 = scmp.lt.s32.totalorder %s1624_s24, %s1624_s24 }
  0x18   : > { %p1627_p0 = pnand %p1625_p13, %p1615_p12  ;;  %p1634_p10 = por %p1633_p7, %p1632_p5 }
  0x1a   : > { %p1628_p3 = pneg %p1627_p0 }
  0x1c   : > { %p1635_p2 = pnand %p1634_p10, %p1628_p3 }
  0x1e   : > { %1638 = shalt.err (!%p1635_p2)
}
  0x1f   : > { %s1738_s25 = smov 128   ;;  %s1739_s26 = smov 8  }
  0x20   : > { %s2303_s6 = sld [smem:[#allocation18_spill]]  ;;  %p31_p9 = scmp.eq.s32.totalorder %s30_s23, 0 }
  0x21   : > { %p40_p12 = scmp.ne.s32.totalorder %s1731_s11, %s1727_s10  ;;  %p41_p10 = scmp.eq.s32.totalorder %s1735_s12, 0 }
  0x22   : > { %p1463_p2 = scmp.lt.s32.totalorder %s1735_s12, 2  ;;  %p2305_p0 = scmp.eq.s32.totalorder %s1848_s13, 1 }
  0x23   : > { %s1898_s29 = scalar_select %p31_p9, %s1731_s11, %s33_s22  }
  0x24   : > { %p42_p13 = por %p41_p10, %p40_p12  ;;  %p1902_p3 = por %p2305_p0, %p40_p12 }
  0x25   : > { %2304 = sst [smem:[#allocation17_spill]] %s1898_s29  ;;  %s298_s18 = sand.u32 1, %s1731_s11  }
  0x26   : > { %1453 = dma.hbm_to_vmem [thread:$0]  (!%p1876_p11), %s2303_s6, 256, %s279_s19, [#allocation10], %s1738_s25, %s1738_s25, %s1739_s26  }
  0x27   : > { %s2306_s14 = scalar_select %p1902_p3, 1, 0 }
  0x28   : > { %s1333_s24 = sshll.u32 %s1735_s12, 7  ;;  %s1332_s21 = sshll.u32 %s298_s18, 3 }
  0x29   : > { %s1911_s27 = scalar_lea.hbm %s2279_s0, %s1333_s24  ;;  %s302_s19 = scalar_lea.vmem [#allocation6], %s1332_s21 }
  0x2a   : > { %s309_s22 = sshll.u32 %s302_s19, 4  ;;  %p1913_p11 = pnand %p1463_p2, %p42_p13  ;;  %s310_s22 = int_to_ptr.vmem [resolvable:$true] %s309_s22 }
  0x2b   : > { %s299_s25 = scalar_lea.sflag [#allocation7], %s298_s18  ;;  %s1639_s26 = scalar_lea.hbm %s1911_s27, 128 }
  0x2c   : > { %p1640_p5 = scmp.ne.s32.totalorder %s1911_s27, %s1639_s26  ;;  %p1641_p7 = pneg %p1913_p11 }
  0x2d   : > { %s1644_s24 = scalar_lea.hbm %s2279_s0, 256  ;;  %p1645_p10 = scmp.lt.s32.totalorder %s1911_s27, %s2279_s0 }
  0x2e   : > { %p1642_p9 = pnand %p1641_p7, %p1640_p5  ;;  %p1646_p2 = scmp.lt.s32.totalorder %s1644_s24, %s1639_s26 }
  0x30   : > { %p1643_p12 = pneg %p1642_p9  ;;  %p1647_p13 = por %p1646_p2, %p1645_p10 }
  0x32   : > { %p1648_p0 = pnand %p1647_p13, %p1643_p12 }
  0x34   : > { %1651 = shalt.err (!%p1648_p0)
}
  0x35   : > { %s1652_s19 = scalar_lea.vmem %s310_s22, 128  ;;  %s1740_s18 = smov [#allocation6]  }
  0x36   : > { %p1653_p1 = scmp.ne.s32.totalorder %s310_s22, %s1652_s19  ;;  %s1657_s6 = sshll.u32 %s1740_s18, 4  ;;  %s1658_s6 = int_to_ptr.vmem [resolvable:$false] %s1657_s6 }
  0x37   : > { %s1659_s29 = scalar_lea.vmem %s1658_s6, 256  ;;  %p1660_p5 = scmp.lt.s32.totalorder %s310_s22, %s1658_s6 }
  0x38   : > { %p1655_p6 = pnand %p1653_p1, %p1641_p7  ;;  %p1661_p9 = scmp.lt.s32.totalorder %s1659_s29, %s1652_s19 }
  0x3a   : > { %p1656_p3 = pneg %p1655_p6  ;;  %p1662_p4 = por %p1661_p9, %p1660_p5 }
  0x3c   : > { %p1663_p8 = pnand %p1662_p4, %p1656_p3 }
  0x3e   : > { %1666 = shalt.err (!%p1663_p8)
}
  0x3f   : > { %1457 = dma.hbm_to_vmem [thread:$0]  (!%p1913_p11), %s1911_s27, 128, %s310_s22, %s299_s25  }
  0x40   : > { %p2308_p12 = scmp.ne.s32.totalorder %s2300_s17, 0 }
  0x41   : > { %s1934_s26 = sand.u32 (!%p2308_p12), 1, %s1727_s10   ;;  %p2309_p1 = scmp.ne.s32.totalorder (!%p2308_p12), %s2297_s15, 0 }
  0x42   : > { %318 = sbr.rel (%p2308_p12) target bundleno = 1203 (0x4b3), region = 56  ;;  %s1335_s16 = sshll.u32 (!%p2308_p12), %s1934_s26, 3 }
  0x43   : > { %s321_s6 = scalar_lea.sflag (!%p2308_p12), [#allocation7], %s1934_s26  ;;  %s324_s29 = scalar_lea.vmem (!%p2308_p12), [#allocation6], %s1335_s16 }
  0x47   : > { %1710 = dma.done.wait (%p2309_p1), %s321_s6, 128  }
  0x48   : > { %1712 = vsyncadd (%p2309_p1), %s321_s6, 4294967168  ;;  %p2310_p4 = scmp.eq.s32.totalorder %s1848_s13, 0 }
  0x4a   : > { %1714 = dma.done.wait (%p2310_p4), [#allocation10], 256   ;;  %p2311_p6 = pmov %p2310_p4 }
  0x4b   : > { %v1741_v0 = vmov 0.0   ;;  %vm1742_vm0 = vmmov 0   ;;  %v367_v1 = vld [vmem:[%s2280_s1 + $0x18] sm:$0xff]  ;;  %v366_v2 = vld [vmem:[%s2280_s1 + $0x10] sm:$0xff]  ;;  %v365_v3 = vld [vmem:[%s2280_s1 + $0x8] sm:$0xff]  ;;  %vm368_vm1 = vcmask 261120  }
  0x4c   : > { %1716 = vsyncadd (%p2311_p6), [#allocation10], 4294967040  ;;  %1393 = vmatprep.subr.mxu0 %v1741_v0  ;;  %1401 = vmatprep.mubr.msk.f32.mxu0 %vm1742_vm0, %v1741_v0  ;;  %v364_v4 = vld [vmem:[%s2280_s1] sm:$0xff]  ;;  %v363_v5 = vld [vmem:[%s324_s29] sm:$0xff]  ;;  %vm442_vm2 = vcmask 523264   ;;  %v1743_v14 = vmov 69  }
  0x4d   : > { %1404 = vmatprep.subr.mxu1 %v1741_v0  ;;  %1420 = vmatprep.mubr.msk.f32.mxu1 %vm1742_vm0, %v1741_v0  ;;  %443 = vst.msk [vmem:[#allocation2] sm:$0xff] %vm442_vm2, %v1741_v0  ;;  %v497_v6 = vld [vmem:[%s2283_s4 + $0x38] sm:$0xff]  ;;  %v496_v7 = vld [vmem:[%s2283_s4 + $0x30] sm:$0xff]  ;;  %v495_v8 = vld [vmem:[%s2283_s4 + $0x28] sm:$0xff]  ;;  %v1744_v15 = vmov 65   ;;  %v1745_v44 = vmov 71  }
  0x4e   : > { %1394 = vmatpush3.msra.mxu0 %v367_v1  ;;  %1405 = vmatpush3.msra.mxu1 %v497_v6  ;;  %v494_v9 = vld [vmem:[%s2283_s4 + $0x20] sm:$0xff]  ;;  %v493_v10 = vld [vmem:[%s2283_s4 + $0x18] sm:$0xff]  ;;  %v492_v11 = vld [vmem:[%s2283_s4 + $0x10] sm:$0xff]  ;;  %v1746_v45 = vmov 67   ;;  %v1747_v48 = vmov 73   ;;  %v1748_v49 = vmov 75  }
  0x4f   : > { %1395 = vmatprep.subr.mxu0 %v1741_v0  ;;  %1406 = vmatprep.subr.mxu1 %v1741_v0  ;;  %v491_v12 = vld [vmem:[%s2283_s4 + $0x8] sm:$0xff]  ;;  %v490_v13 = vld [vmem:[%s2283_s4] sm:$0xff]  ;;  %v1749_v50 = vmov 77   ;;  %v1750_v51 = vmov 64   ;;  %v1751_v52 = vmov 79   ;;  %v1752_v53 = vmov 70  }
  0x50   : > { %1396 = vmatpush3.msra.mxu0 %v366_v2  ;;  %1407 = vmatpush3.msra.mxu1 %v496_v7  ;;  %v1339_v18 = vld [vmem:[%s2281_s2 + $0x3] ss:$0 sm:$0xff]  ;;  %v1340_v19 = vld [vmem:[%s2281_s2 + $0x2] ss:$0 sm:$0xff]  ;;  %v1341_v22 = vld [vmem:[%s2281_s2 + $0x1] ss:$0 sm:$0xff] }
  0x51   : > { %1397 = vmatprep.subr.mxu0 %v1741_v0  ;;  %1408 = vmatprep.subr.mxu1 %v1741_v0  ;;  %v1342_v26 = vld [vmem:[%s2281_s2] ss:$0 sm:$0xff]  ;;  %v1753_v56 = vmov 66   ;;  %v1754_v57 = vmov 76   ;;  %v1755_v58 = vmov 68   ;;  %v1756_v59 = vmov 83  }
  0x52   : > { %1398 = vmatpush3.msra.mxu0 %v365_v3  ;;  %1409 = vmatpush3.msra.mxu1 %v495_v8  ;;  %v1343_v31 = vld [vmem:[%s2282_s3] ss:$0 sm:$0xff]  ;;  %v1757_v60 = vmov 72   ;;  %v1350_v1 = vld [vmem:[#allocation9 + $0x3] ss:$0 sm:$0xff]  ;;  %v1758_v2 = vmov 74  }
  0x53   : > { %1399 = vmatprep.subr.mxu0 %v1741_v0  ;;  %1410 = vmatprep.subr.mxu1 %v1741_v0  ;;  %v1346_v39 = vld [vmem:[%s2284_s5] ss:$0 sm:$0xff]  ;;  %v1348_v3 = vld [vmem:[#allocation9 + $0x1] ss:$0 sm:$0xff]  ;;  %v1358_v7 = vld [vmem:[#allocation9 + $0xb] ss:$0 sm:$0xff] }
  0x54   : > { %1400 = vmatpush3.msra.mxu0 %v364_v4  ;;  %1411 = vmatpush3.msra.mxu1 %v494_v9  ;;  %v1354_v4 = vld [vmem:[#allocation9 + $0x7] ss:$0 sm:$0xff]  ;;  %v1356_v8 = vld [vmem:[#allocation9 + $0x9] ss:$0 sm:$0xff]  ;;  %v1362_v9 = vld [vmem:[#allocation9 + $0xf] ss:$0 sm:$0xff] }
  0x55   : > { %1402 = vmatmul.mubr.msk.f32.vlgmr.msra.gmra.mxu0 %vm368_vm1, %v363_v5  ;;  %1423 = vmatprep.subr.mxu0 %v1741_v0  ;;  %v1352_v5 = vld [vmem:[#allocation9 + $0x5] ss:$0 sm:$0xff]  ;;  %s1761_s20 = smov 64   ;;  %vm617_vm3 = vcmask 1048064   ;;  %s1367_s29 = sshll.u32 %s1848_s13, 7 }
  0x56   : > { %1439 = vmatprep.mubr.msk.f32.mxu0 %vm1742_vm0, %v1741_v0  ;;  %1412 = vmatprep.subr.mxu1 %v1741_v0  ;;  %s362_s15 = scalar_lea.vmem [#allocation11], %s1335_s16  ;;  %s2235_s23 = scalar_lea.hbm %s2288_s9, %s1367_s29 }
  0x57   : > { %1413 = vmatpush3.msra.mxu1 %v493_v10  ;;  %1538 = vset.pattern.permute.xlu1 %v1743_v14  ;;  %v1360_v14 = vld [vmem:[#allocation9 + $0xd] ss:$0 sm:$0xff]  ;;  %s1248_s17 = sshll.u32 %s362_s15, 4  ;;  %s1235_s25 = scalar_lea.sflag [#allocation8], %s1934_s26  ;;  %s2237_s17 = int_to_ptr.vmem [resolvable:$true] %s1248_s17 }
  0x58   : > { %1414 = vmatprep.subr.mxu1 %v1741_v0  ;;  %1536 = vset.pattern.permute.xlu0 %v1744_v15  ;;  %s1667_s28 = scalar_lea.vmem %s2237_s17, 128  ;;  %p2312_p3 = scmp.ne.s32.totalorder %s2306_s14, 0 }
  0x59   : > { %1415 = vmatpush3.msra.mxu1 %v492_v11  ;;  %p1668_p8 = scmp.ne.s32.totalorder %s2237_s17, %s1667_s28  ;;  %s1776_s13 = smov [#allocation11]  }
  0x5a   : > { %1416 = vmatprep.subr.mxu1 %v1741_v0  ;;  %s1671_s16 = sshll.u32 %s1776_s13, 4  ;;  %s1672_s16 = int_to_ptr.vmem [resolvable:$false] %s1671_s16 }
  0x5b   : > { %1417 = vmatpush3.msra.mxu1 %v491_v12  ;;  %p1669_p11 = pnand %p1668_p8, %p2312_p3  ;;  %s1673_s24 = scalar_lea.vmem %s1672_s16, 256 }
  0x5c   : > { %1418 = vmatprep.subr.mxu1 %v1741_v0  ;;  %p1674_p10 = scmp.lt.s32.totalorder %s2237_s17, %s1672_s16  ;;  %p1675_p2 = scmp.lt.s32.totalorder %s1673_s24, %s1667_s28 }
  0x5d   : > { %1419 = vmatpush3.msra.mxu1 %v490_v13  ;;  %p1670_p7 = pneg %p1669_p11 }
  0x5e   : > { %p1676_p13 = por %p1675_p2, %p1674_p10 }
  0x60   : > { %p1677_p0 = pnand %p1676_p13, %p1670_p7 }
 0x115   : > { %v2006_v16 = vpop.f32.mrf.mxu0 }
 0x116   : > { %444 = vst.msk [vmem:[#allocation2 + $0x8] sm:$0xff] %vm442_vm2, %v2006_v16  ;;  %v450_v23 = vmul.f32 %v1339_v18, %v2006_v16  ;;  %v1349_v18 = vld [vmem:[#allocation9 + $0x2] ss:$0 sm:$0xff] }
 0x117   : > { %v1403_v17 = vpop.f32.mrf.mxu0 }
 0x11d   : > { %v451_v20 = vld [vmem:[#allocation2 + $0x7] sm:$0xff] }
 0x11e   : > { %v459_v21 = vld [vmem:[#allocation2 + $0x6] sm:$0xff]  ;;  %v457_v24 = vmul.f32 %v1340_v19, %v451_v20  ;;  %v1347_v19 = vld [vmem:[#allocation9] ss:$0 sm:$0xff]  ;;  %v1759_v20 = vmov 78  }
 0x11f   : > { %v467_v25 = vld [vmem:[#allocation2 + $0x5] sm:$0xff]  ;;  %v465_v28 = vmul.f32 %v1341_v22, %v459_v21 }
 0x120   : > { %v458_v27 = vadd.f32 %v457_v24, %v450_v23  ;;  %v473_v30 = vmul.f32 %v1342_v26, %v467_v25 }
 0x122   : > { %v466_v29 = vadd.f32 %v465_v28, %v458_v27  ;;  %v1353_v27 = vld [vmem:[#allocation9 + $0x6] ss:$0 sm:$0xff] }
 0x124   : > { %v474_v32 = vadd.f32 %v473_v30, %v466_v29  ;;  %v1351_v30 = vld [vmem:[#allocation9 + $0x4] ss:$0 sm:$0xff] }
 0x126   : > { %v482_v33 = vadd.f32 %v1343_v31, %v474_v32 }
 0x128   : > { %v1344_v34 = vmul.f32 -1.442695, %v482_v33 }
 0x12a   : > { %1569 = vpow2.f32 %v1344_v34 }
 0x137   : > { %v1570_v35 = vpop.eup %1569 }
 0x138   : > { %v486_v36 = vadd.f32 1.0, %v1570_v35 }
 0x13a   : > { %1571 = vrcp.f32 %v486_v36  ;;  %v1355_v36 = vld [vmem:[#allocation9 + $0x8] ss:$0 sm:$0xff] }
 0x147   : > { %v1572_v37 = vpop.eup %1571 }
 0x148   : > { %v2026_v38 = vmul.f32 %v1572_v37, %v482_v33  ;;  %v1357_v33 = vld [vmem:[#allocation9 + $0xa] ss:$0 sm:$0xff] }
 0x14a   : > { %1421 = vmatmul.mubr.msk.f32.vlgmr.msra.gmra.mxu1 %vm442_vm2, %v2026_v38 }
 0x20a   : > { %v2033_v40 = vpop.f32.mrf.mxu1 }
 0x20b   : > { %696 = vperm.xlu1 %1538, %v2033_v40   ;;  %620 = vperm.xlu0 %1536, %v2033_v40   ;;  %v578_v41 = vadd.f32 %v1346_v39, %v2033_v40  ;;  %v1760_v39 = vmov 81  }
 0x20c   : > { %v1422_v42 = vpop.f32.mrf.mxu1 }
 0x20d   : > { %v580_v43 = vand.u32 2147483647, %v578_v41  ;;  %v579_v62 = vmax.f32 %v578_v41, 0.0  ;;  %v1361_v42 = vld [vmem:[#allocation9 + $0xe] ss:$0 sm:$0xff] }
 0x20f   : > { %1539 = vset.pattern.permute.xlu1 %v1745_v44  ;;  %1537 = vset.pattern.permute.xlu0 %v1746_v45  ;;  %v581_v46 = vsub.f32 0.0, %v580_v43  ;;  %v1359_v45 = vld [vmem:[#allocation9 + $0xc] ss:$0 sm:$0xff] }
 0x210   : > { %734 = vperm.xlu1 %1539, %v2033_v40   ;;  %658 = vperm.xlu0 %1537, %v2033_v40  }
 0x211   : > { %v582_v47 = vmul.f32 1.442695, %v581_v46 }
 0x213   : > { %1573 = vpow2.f32 %v582_v47 }
 0x214   : > { %1540 = vset.pattern.permute.xlu1 %v1747_v48  ;;  %1541 = vset.pattern.permute.xlu0 %v1748_v49 }
 0x215   : > { %772 = vperm.xlu1 %1540, %v2033_v40   ;;  %810 = vperm.xlu0 %1541, %v2033_v40  }
 0x219   : > { %1542 = vset.pattern.permute.xlu1 %v1749_v50  ;;  %1544 = vset.pattern.permute.xlu0 %v1750_v51 }
 0x21a   : > { %848 = vperm.xlu1 %1542, %v2033_v40   ;;  %600 = vperm.xlu0 %1544, %v2033_v40  }
 0x21e   : > { %1543 = vset.pattern.permute.xlu1 %v1751_v52  ;;  %1547 = vset.pattern.permute.xlu0 %v1752_v53 }
 0x21f   : > { %886 = vperm.xlu1 %1543, %v2033_v40   ;;  %715 = vperm.xlu0 %1547, %v2033_v40  }
 0x220   : > { %v1574_v54 = vpop.eup %1573 }
 0x221   : > { %v584_v55 = vadd.f32 1.0, %v1574_v54 }
 0x223   : > { %1545 = vset.pattern.permute.xlu1 %v1753_v56  ;;  %1550 = vset.pattern.permute.xlu0 %v1754_v57  ;;  %1575 = vlog2.f32 %v584_v55 }
 0x224   : > { %639 = vperm.xlu1 %1545, %v2033_v40   ;;  %829 = vperm.xlu0 %1550, %v2033_v40  }
 0x228   : > { %1546 = vset.pattern.permute.xlu1 %v1755_v58  ;;  %1553 = vset.pattern.permute.xlu0 %v1756_v59 }
 0x229   : > { %677 = vperm.xlu1 %1546, %v2033_v40  }
 0x22d   : > { %1548 = vset.pattern.permute.xlu1 %v1757_v60 }
 0x22e   : > { %753 = vperm.xlu1 %1548, %v2033_v40  }
 0x230   : > { %v1576_v61 = vpop.eup %1575 }
 0x231   : > { %v586_v63 = vmul.f32 0.6931472, %v1576_v61 }
 0x232   : > { %1549 = vset.pattern.permute.xlu1 %v1758_v2 }
 0x233   : > { %791 = vperm.xlu1 %1549, %v2033_v40   ;;  %v2051_v6 = vadd.f32 %v586_v63, %v579_v62 }
 0x235   : > { %v649_v10 = vmul.f32 %v1350_v1, %v2051_v6  ;;  %v610_v11 = vmul.f32 %v1348_v3, %v2051_v6  ;;  %v725_v12 = vmul.f32 %v1354_v4, %v2051_v6  ;;  %v687_v13 = vmul.f32 %v1352_v5, %v2051_v6 }
 0x236   : > { %v801_v15 = vmul.f32 %v1358_v7, %v2051_v6  ;;  %v763_v17 = vmul.f32 %v1356_v8, %v2051_v6  ;;  %v877_v24 = vmul.f32 %v1362_v9, %v2051_v6  ;;  %v839_v26 = vmul.f32 %v1360_v14, %v2051_v6 }
 0x237   : > { %1551 = vset.pattern.permute.xlu1 %v1759_v20  ;;  %v650_v21 = vmul.f32 1.442695, %v649_v10  ;;  %v611_v22 = vmul.f32 1.442695, %v610_v11  ;;  %v726_v23 = vmul.f32 1.442695, %v725_v12  ;;  %v634_v29 = vmul.f32 %v1349_v18, %v2051_v6 }
 0x238   : > { %867 = vperm.xlu1 %1551, %v2033_v40   ;;  %v688_v25 = vmul.f32 1.442695, %v687_v13  ;;  %v802_v28 = vmul.f32 1.442695, %v801_v15  ;;  %v764_v31 = vmul.f32 1.442695, %v763_v17  ;;  %v594_v32 = vmul.f32 %v1347_v19, %v2051_v6 }
 0x239   : > { %1577 = vpow2.f32 %v650_v21  ;;  %v878_v34 = vmul.f32 1.442695, %v877_v24  ;;  %v710_v35 = vmul.f32 %v1353_v27, %v2051_v6  ;;  %v840_v37 = vmul.f32 1.442695, %v839_v26 }
 0x23a   : > { %1579 = vpow2.f32 %v611_v22  ;;  %v672_v41 = vmul.f32 %v1351_v30, %v2051_v6  ;;  %v635_v43 = vmul.f32 1.442695, %v634_v29  ;;  %v786_v44 = vmul.f32 %v1357_v33, %v2051_v6 }
 0x23b   : > { %1581 = vpow2.f32 %v726_v23  ;;  %v595_v46 = vmul.f32 1.442695, %v594_v32  ;;  %v748_v47 = vmul.f32 %v1355_v36, %v2051_v6  ;;  %v711_v48 = vmul.f32 1.442695, %v710_v35 }
 0x23c   : > { %1583 = vpow2.f32 %v688_v25  ;;  %1552 = vset.pattern.permute.xlu1 %v1760_v39  ;;  %v862_v49 = vmul.f32 %v1361_v42, %v2051_v6  ;;  %v673_v50 = vmul.f32 1.442695, %v672_v41  ;;  %v824_v51 = vmul.f32 %v1359_v45, %v2051_v6 }
 0x23d   : > { %1585 = vpow2.f32 %v802_v28  ;;  %v787_v52 = vmul.f32 1.442695, %v786_v44  ;;  %v749_v53 = vmul.f32 1.442695, %v748_v47  ;;  %v2088_v10 = vmul.f32 %v2051_v6, %v2026_v38 }
 0x23e   : > { %1587 = vpow2.f32 %v764_v31  ;;  %v863_v54 = vmul.f32 1.442695, %v862_v49  ;;  %v825_v55 = vmul.f32 1.442695, %v824_v51  ;;  %v1762_v35 = vmov 85  }
 0x23f   : > { %1589 = vpow2.f32 %v878_v34  ;;  %v1763_v39 = vmov 89   ;;  %v1764_v41 = vmov 87   ;;  %v1765_v44 = vmov 95  }
 0x240   : > { %1591 = vpow2.f32 %v840_v37  ;;  %v1766_v45 = vmov 91   ;;  %v1768_v49 = vmov 93  }
 0x241   : > { %1593 = vpow2.f32 %v635_v43 }
 0x242   : > { %1595 = vpow2.f32 %v595_v46 }
 0x243   : > { %1597 = vpow2.f32 %v711_v48  ;;  %v1767_v48 = vmov 84  }
 0x244   : > { %1599 = vpow2.f32 %v673_v50 }
 0x245   : > { %1601 = vpow2.f32 %v787_v52  ;;  %v1769_v52 = vmov 80  }
 0x246   : > { %v1578_v56 = vpop.eup %1577  ;;  %1603 = vpow2.f32 %v749_v53 }
 0x247   : > { %v1580_v57 = vpop.eup %1579  ;;  %653 = vrot.lane.b32.xlu0 %v1578_v56, %s1761_s20  ;;  %1605 = vpow2.f32 %v863_v54  ;;  %v1770_v54 = vmov 82  }
 0x248   : > { %v1582_v58 = vpop.eup %1581  ;;  %614 = vrot.lane.b32.xlu1 %v1580_v57, %s1761_s20  ;;  %1607 = vpow2.f32 %v825_v55 }
 0x249   : > { %v1584_v59 = vpop.eup %1583 }
 0x24a   : > { %v1586_v60 = vpop.eup %1585 }
 0x24b   : > { %v1588_v61 = vpop.eup %1587  ;;  %729 = vrot.lane.b32.xlu0 %v1582_v58, %s1761_s20 }
 0x24c   : > { %v1590_v62 = vpop.eup %1589  ;;  %691 = vrot.lane.b32.xlu1 %v1584_v59, %s1761_s20 }
 0x24d   : > { %v1592_v63 = vpop.eup %1591 }
 0x24e   : > { %v1594_v1 = vpop.eup %1593 }
 0x24f   : > { %v1596_v2 = vpop.eup %1595  ;;  %805 = vrot.lane.b32.xlu0 %v1586_v60, %s1761_s20  ;;  %637 = vst.msk [vmem:[#allocation3 + $0x8] sm:$0xff] %vm442_vm2, %v1594_v1  ;;  %v1771_v60 = vmov 86  }
 0x250   : > { %v1598_v3 = vpop.eup %1597  ;;  %767 = vrot.lane.b32.xlu1 %v1588_v61, %s1761_s20  ;;  %597 = vst.msk [vmem:[#allocation3] sm:$0xff] %vm442_vm2, %v1596_v2 }
 0x251   : > { %v1600_v4 = vpop.eup %1599  ;;  %713 = vst.msk [vmem:[#allocation3 + $0x18] sm:$0xff] %vm442_vm2, %v1598_v3 }
 0x252   : > { %v1602_v5 = vpop.eup %1601  ;;  %675 = vst.msk [vmem:[#allocation3 + $0x10] sm:$0xff] %vm442_vm2, %v1600_v4 }
 0x253   : > { %v1604_v7 = vpop.eup %1603  ;;  %881 = vrot.lane.b32.xlu0 %v1590_v62, %s1761_s20  ;;  %789 = vst.msk [vmem:[#allocation3 + $0x28] sm:$0xff] %vm442_vm2, %v1602_v5 }
 0x254   : > { %v1606_v8 = vpop.eup %1605  ;;  %843 = vrot.lane.b32.xlu1 %v1592_v63, %s1761_s20  ;;  %751 = vst.msk [vmem:[#allocation3 + $0x20] sm:$0xff] %vm442_vm2, %v1604_v7 }
 0x255   : > { %v1608_v9 = vpop.eup %1607  ;;  %865 = vst.msk [vmem:[#allocation3 + $0x38] sm:$0xff] %vm442_vm2, %v1606_v8 }
 0x256   : > { %827 = vst.msk [vmem:[#allocation3 + $0x30] sm:$0xff] %vm442_vm2, %v1608_v9 }
 0x286   : > { %v697_v11 = vpop.permute.xlu1 %696  ;;  %v621_v12 = vpop.permute.xlu0 %620 }
 0x287   : > { %v623_v13 = vmul.f32 %v621_v12, %v2088_v10  ;;  %v699_v14 = vmul.f32 %v697_v11, %v2088_v10 }
 0x289   : > { %625 = vrot.lane.b32.xlu1 %v623_v13, %s1761_s20 }
 0x28b   : > { %v735_v15 = vpop.permute.xlu1 %734  ;;  %v659_v17 = vpop.permute.xlu0 %658 }
 0x28c   : > { %v661_v18 = vmul.f32 %v659_v17, %v2088_v10  ;;  %v737_v19 = vmul.f32 %v735_v15, %v2088_v10 }
 0x28d   : > { %701 = vrot.lane.b32.xlu1 %v699_v14, %s1761_s20 }
 0x28e   : > { %663 = vrot.lane.b32.xlu0 %v661_v18, %s1761_s20 }
 0x290   : > { %v773_v6 = vpop.permute.xlu1 %772  ;;  %v811_v20 = vpop.permute.xlu0 %810 }
 0x291   : > { %v775_v21 = vmul.f32 %v773_v6, %v2088_v10  ;;  %v813_v22 = vmul.f32 %v811_v20, %v2088_v10 }
 0x292   : > { %739 = vrot.lane.b32.xlu0 %v737_v19, %s1761_s20 }
 0x293   : > { %777 = vrot.lane.b32.xlu1 %v775_v21, %s1761_s20 }
 0x295   : > { %v849_v23 = vpop.permute.xlu1 %848  ;;  %v601_v24 = vpop.permute.xlu0 %600 }
 0x296   : > { %v851_v25 = vmul.f32 %v849_v23, %v2088_v10  ;;  %v603_v26 = vmul.f32 %v601_v24, %v2088_v10  ;;  %815 = vrot.lane.b32.xlu0 %v813_v22, %s1761_s20 }
 0x298   : > { %604 = vst.msk [vmem:[#allocation4] sm:$0xff] %vm442_vm2, %v603_v26  ;;  %853 = vrot.lane.b32.xlu1 %v851_v25, %s1761_s20 }
 0x29a   : > { %v887_v27 = vpop.permute.xlu1 %886  ;;  %v716_v28 = vpop.permute.xlu0 %715 }
 0x29b   : > { %v889_v29 = vmul.f32 %v887_v27, %v2088_v10  ;;  %v718_v30 = vmul.f32 %v716_v28, %v2088_v10 }
 0x29c   : > { %1003 = vperm.xlu1 %1552, %v2033_v40  }
 0x29d   : > { %719 = vst.msk [vmem:[#allocation4 + $0x18] sm:$0xff] %vm442_vm2, %v718_v30  ;;  %891 = vrot.lane.b32.xlu0 %v889_v29, %s1761_s20 }
 0x29f   : > { %v640_v31 = vpop.permute.xlu1 %639  ;;  %v830_v32 = vpop.permute.xlu0 %829 }
 0x2a0   : > { %v642_v33 = vmul.f32 %v640_v31, %v2088_v10  ;;  %v832_v34 = vmul.f32 %v830_v32, %v2088_v10  ;;  %1554 = vset.pattern.permute.xlu1 %v1762_v35 }
 0x2a1   : > { %1020 = vperm.xlu0 %1553, %v2033_v40   ;;  %1037 = vperm.xlu1 %1554, %v2033_v40  }
 0x2a2   : > { %643 = vst.msk [vmem:[#allocation4 + $0x8] sm:$0xff] %vm442_vm2, %v642_v33  ;;  %833 = vst.msk [vmem:[#allocation4 + $0x30] sm:$0xff] %vm442_vm2, %v832_v34 }
 0x2a4   : > { %v678_v36 = vpop.permute.xlu1 %677 }
 0x2a5   : > { %v680_v37 = vmul.f32 %v678_v36, %v2088_v10  ;;  %1556 = vset.pattern.permute.xlu0 %v1763_v39  ;;  %1555 = vset.pattern.permute.xlu1 %v1764_v41 }
 0x2a6   : > { %1071 = vperm.xlu0 %1556, %v2033_v40   ;;  %1054 = vperm.xlu1 %1555, %v2033_v40  }
 0x2a7   : > { %681 = vst.msk [vmem:[#allocation4 + $0x10] sm:$0xff] %vm442_vm2, %v680_v37 }
 0x2a9   : > { %v754_v42 = vpop.permute.xlu1 %753 }
 0x2aa   : > { %v756_v43 = vmul.f32 %v754_v42, %v2088_v10  ;;  %1559 = vset.pattern.permute.xlu0 %v1765_v44  ;;  %1557 = vset.pattern.permute.xlu1 %v1766_v45 }
 0x2ab   : > { %1122 = vperm.xlu0 %1559, %v2033_v40   ;;  %1088 = vperm.xlu1 %1557, %v2033_v40  }
 0x2ac   : > { %757 = vst.msk [vmem:[#allocation4 + $0x20] sm:$0xff] %vm442_vm2, %v756_v43 }
 0x2ae   : > { %v792_v46 = vpop.permute.xlu1 %791 }
 0x2af   : > { %v794_v47 = vmul.f32 %v792_v46, %v2088_v10  ;;  %1562 = vset.pattern.permute.xlu0 %v1767_v48  ;;  %1558 = vset.pattern.permute.xlu1 %v1768_v49 }
 0x2b0   : > { %1031 = vperm.xlu0 %1562, %v2033_v40   ;;  %1105 = vperm.xlu1 %1558, %v2033_v40  }
 0x2b1   : > { %795 = vst.msk [vmem:[#allocation4 + $0x28] sm:$0xff] %vm442_vm2, %v794_v47 }
 0x2b3   : > { %v868_v50 = vpop.permute.xlu1 %867 }
 0x2b4   : > { %v870_v51 = vmul.f32 %v868_v50, %v2088_v10  ;;  %1560 = vset.pattern.permute.xlu1 %v1769_v52  ;;  %1568 = vset.pattern.permute.xlu0 %v1765_v44 }
 0x2b5   : > { %998 = vperm.xlu1 %1560, %v2033_v40  }
 0x2b6   : > { %871 = vst.msk [vmem:[#allocation4 + $0x38] sm:$0xff] %vm442_vm2, %v870_v51 }
 0x2b9   : > { %v654_v53 = vpop.permute.xlu0 %653  ;;  %1561 = vset.pattern.permute.xlu1 %v1770_v54 }
 0x2ba   : > { %656 = vst.msk [vmem:[#allocation3 + $0x8] sm:$0xff] %vm617_vm3, %v654_v53  ;;  %v615_v55 = vpop.permute.xlu1 %614  ;;  %1014 = vperm.xlu1 %1561, %v2033_v40  }
 0x2bb   : > { %618 = vst.msk [vmem:[#allocation3] sm:$0xff] %vm617_vm3, %v615_v55 }
 0x2bd   : > { %v730_v56 = vpop.permute.xlu0 %729 }
 0x2be   : > { %732 = vst.msk [vmem:[#allocation3 + $0x18] sm:$0xff] %vm617_vm3, %v730_v56  ;;  %v692_v57 = vpop.permute.xlu1 %691  ;;  %1563 = vset.pattern.permute.xlu1 %v1771_v60 }
 0x2bf   : > { %694 = vst.msk [vmem:[#allocation3 + $0x10] sm:$0xff] %vm617_vm3, %v692_v57 }
 0x2c1   : > { %v806_v58 = vpop.permute.xlu0 %805 }
 0x2c2   : > { %808 = vst.msk [vmem:[#allocation3 + $0x28] sm:$0xff] %vm617_vm3, %v806_v58  ;;  %v768_v59 = vpop.permute.xlu1 %767 }
 0x2c3   : > { %770 = vst.msk [vmem:[#allocation3 + $0x20] sm:$0xff] %vm617_vm3, %v768_v59 }
 0x2c5   : > { %v882_v61 = vpop.permute.xlu0 %881 }
 0x2c6   : > { %884 = vst.msk [vmem:[#allocation3 + $0x38] sm:$0xff] %vm617_vm3, %v882_v61  ;;  %v844_v62 = vpop.permute.xlu1 %843  ;;  %v895_v10 = vld [vmem:[#allocation3] ss:$8 sm:$0xf] }
 0x2c7   : > { %846 = vst.msk [vmem:[#allocation3 + $0x30] sm:$0xff] %vm617_vm3, %v844_v62  ;;  %v906_v18 = vld [vmem:[#allocation3 + $0x1] ss:$8 sm:$0xf] }
 0x2c8   : > { %v919_v25 = vld [vmem:[#allocation3 + $0x2] ss:$8 sm:$0xf]  ;;  %v932_v33 = vld [vmem:[#allocation3 + $0x3] ss:$8 sm:$0xf] }
 0x2c9   : > { %v945_v43 = vld [vmem:[#allocation3 + $0x4] ss:$8 sm:$0xf]  ;;  %v958_v51 = vld [vmem:[#allocation3 + $0x5] ss:$8 sm:$0xf] }
 0x2ca   : > { %v971_v59 = vld [vmem:[#allocation3 + $0x6] ss:$8 sm:$0xf] }
 0x2ce   : > { %v896_v9 = vld [vmem:[#allocation3] ss:$8 sm:$0xf0]  ;;  %v907_v12 = vld [vmem:[#allocation3 + $0x1] ss:$8 sm:$0xf0] }
 0x2cf   : > { %v897_v11 = vor.u32 %v896_v9, %v895_v10  ;;  %v908_v6 = vor.u32 %v907_v12, %v906_v18  ;;  %v920_v21 = vld [vmem:[#allocation3 + $0x2] ss:$8 sm:$0xf0]  ;;  %v933_v29 = vld [vmem:[#allocation3 + $0x3] ss:$8 sm:$0xf0] }
 0x2d0   : > { %v921_v27 = vor.u32 %v920_v21, %v919_v25  ;;  %v934_v35 = vor.u32 %v933_v29, %v932_v33  ;;  %v946_v37 = vld [vmem:[#allocation3 + $0x4] ss:$8 sm:$0xf0]  ;;  %v959_v47 = vld [vmem:[#allocation3 + $0x5] ss:$8 sm:$0xf0] }
 0x2d1   : > { %v901_v15 = vmul.f32 0.0, %v897_v11  ;;  %v947_v45 = vor.u32 %v946_v37, %v945_v43  ;;  %v960_v53 = vor.u32 %v959_v47, %v958_v51  ;;  %v972_v55 = vld [vmem:[#allocation3 + $0x6] ss:$8 sm:$0xf0] }
 0x2d2   : > { %v973_v61 = vor.u32 %v972_v55, %v971_v59  ;;  %v1159_v37 = vld [vmem:[%s2287_s8 + $0x38] sm:$0xff]  ;;  %v1158_v43 = vld [vmem:[%s2287_s8 + $0x30] sm:$0xff] }
 0x2d3   : > { %1424 = vmatpush3.msra.mxu0 %v1159_v37 }
 0x2d4   : > { %1425 = vmatprep.subr.mxu0 %v1741_v0 }
 0x2d5   : > { %1426 = vmatpush3.msra.mxu0 %v1158_v43 }
 0x2d6   : > { %1427 = vmatprep.subr.mxu0 %v1741_v0 }
 0x2fb   : > { %v626_v63 = vpop.permute.xlu1 %625 }
 0x2fc   : > { %628 = vst.msk [vmem:[#allocation4] sm:$0xff] %vm617_vm3, %v626_v63  ;;  %v985_v63 = vld [vmem:[#allocation3 + $0x7] ss:$8 sm:$0xf0] }
 0x2ff   : > { %v702_v1 = vpop.permute.xlu1 %701 }
 0x300   : > { %704 = vst.msk [vmem:[#allocation4 + $0x10] sm:$0xff] %vm617_vm3, %v702_v1  ;;  %v664_v2 = vpop.permute.xlu0 %663 }
 0x301   : > { %666 = vst.msk [vmem:[#allocation4 + $0x8] sm:$0xff] %vm617_vm3, %v664_v2 }
 0x304   : > { %v740_v3 = vpop.permute.xlu0 %739 }
 0x305   : > { %742 = vst.msk [vmem:[#allocation4 + $0x18] sm:$0xff] %vm617_vm3, %v740_v3  ;;  %v778_v4 = vpop.permute.xlu1 %777 }
 0x306   : > { %780 = vst.msk [vmem:[#allocation4 + $0x20] sm:$0xff] %vm617_vm3, %v778_v4  ;;  %v984_v4 = vld [vmem:[#allocation3 + $0x7] ss:$8 sm:$0xf] }
 0x308   : > { %v816_v5 = vpop.permute.xlu0 %815 }
 0x309   : > { %818 = vst.msk [vmem:[#allocation4 + $0x28] sm:$0xff] %vm617_vm3, %v816_v5 }
 0x30a   : > { %v854_v7 = vpop.permute.xlu1 %853 }
 0x30b   : > { %856 = vst.msk [vmem:[#allocation4 + $0x30] sm:$0xff] %vm617_vm3, %v854_v7  ;;  %v986_v7 = vor.u32 %v985_v63, %v984_v4 }
 0x30c   : > { %v898_v13 = vld [vmem:[#allocation4] ss:$8 sm:$0xf]  ;;  %v910_v22 = vld [vmem:[#allocation4 + $0x1] ss:$8 sm:$0xf] }
 0x30d   : > { %v923_v30 = vld [vmem:[#allocation4 + $0x2] ss:$8 sm:$0xf]  ;;  %v936_v39 = vld [vmem:[#allocation4 + $0x3] ss:$8 sm:$0xf] }
 0x30e   : > { %v949_v48 = vld [vmem:[#allocation4 + $0x4] ss:$8 sm:$0xf]  ;;  %v962_v56 = vld [vmem:[#allocation4 + $0x5] ss:$8 sm:$0xf] }
 0x30f   : > { %v892_v8 = vpop.permute.xlu0 %891  ;;  %v975_v1 = vld [vmem:[#allocation4 + $0x6] ss:$8 sm:$0xf]  ;;  %v988_v9 = vld [vmem:[#allocation4 + $0x7] ss:$8 sm:$0xf] }
 0x310   : > { %894 = vst.msk [vmem:[#allocation4 + $0x38] sm:$0xff] %vm617_vm3, %v892_v8 }
 0x317   : > { %v899_v14 = vld [vmem:[#allocation4] ss:$8 sm:$0xf0]  ;;  %v911_v19 = vld [vmem:[#allocation4 + $0x1] ss:$8 sm:$0xf0] }
 0x318   : > { %v900_v17 = vor.u32 %v899_v14, %v898_v13  ;;  %v912_v23 = vor.u32 %v911_v19, %v910_v22  ;;  %v924_v26 = vld [vmem:[#allocation4 + $0x2] ss:$8 sm:$0xf0]  ;;  %v937_v34 = vld [vmem:[#allocation4 + $0x3] ss:$8 sm:$0xf0]  ;;  %v1004_v14 = vpop.permute.xlu1 %1003 }
 0x319   : > { %v925_v31 = vor.u32 %v924_v26, %v923_v30  ;;  %v938_v41 = vor.u32 %v937_v34, %v936_v39  ;;  %v950_v44 = vld [vmem:[#allocation4 + $0x4] ss:$8 sm:$0xf0]  ;;  %v963_v52 = vld [vmem:[#allocation4 + $0x5] ss:$8 sm:$0xf0] }
 0x31a   : > { %v902_v20 = vadd.f32 %v901_v15, %v900_v17  ;;  %v951_v49 = vor.u32 %v950_v44, %v949_v48  ;;  %v964_v57 = vor.u32 %v963_v52, %v962_v56  ;;  %v976_v60 = vld [vmem:[#allocation4 + $0x6] ss:$8 sm:$0xf0]  ;;  %v989_v5 = vld [vmem:[#allocation4 + $0x7] ss:$8 sm:$0xf0] }
 0x31b   : > { %v977_v2 = vor.u32 %v976_v60, %v975_v1  ;;  %v990_v10 = vor.u32 %v989_v5, %v988_v9  ;;  %v1364_v13 = vmul.f32 -1.442695, %v2006_v16  ;;  %v1773_v34 = vmov 90   ;;  %v1157_v44 = vld [vmem:[%s2287_s8 + $0x28] sm:$0xff]  ;;  %v1154_v52 = vld [vmem:[%s2287_s8 + $0x10] sm:$0xff] }
 0x31c   : > { %903 = vst [vmem:[#allocation5] ss:$8 sm:$0xf] %v902_v20  ;;  %v913_v24 = vmul.f32 %v908_v6, %v902_v20  ;;  %904 = vst [vmem:[#allocation5] ss:$8 sm:$0xf0] %v902_v20  ;;  %v1021_v17 = vpop.permute.xlu0 %1020  ;;  %v1038_v20 = vpop.permute.xlu1 %1037  ;;  %1428 = vmatpush3.msra.mxu0 %v1157_v44 }
 0x31d   : > { %1609 = vpow2.f32 %v1364_v13  ;;  %1429 = vmatprep.subr.mxu0 %v1741_v0 }
 0x31e   : > { %v914_v28 = vadd.f32 %v913_v24, %v912_v23 }
 0x320   : > { %916 = vst [vmem:[#allocation5 + $0x1] ss:$8 sm:$0xf] %v914_v28  ;;  %v926_v32 = vmul.f32 %v921_v27, %v914_v28  ;;  %917 = vst [vmem:[#allocation5 + $0x1] ss:$8 sm:$0xf0] %v914_v28 }
 0x321   : > { %v1055_v24 = vpop.permute.xlu1 %1054  ;;  %v1772_v28 = vmov 88   ;;  %v1072_v29 = vpop.permute.xlu0 %1071 }
 0x322   : > { %v927_v36 = vadd.f32 %v926_v32, %v925_v31 }
 0x324   : > { %929 = vst [vmem:[#allocation5 + $0x2] ss:$8 sm:$0xf] %v927_v36  ;;  %v939_v42 = vmul.f32 %v934_v35, %v927_v36  ;;  %930 = vst [vmem:[#allocation5 + $0x2] ss:$8 sm:$0xf0] %v927_v36 }
 0x326   : > { %v940_v46 = vadd.f32 %v939_v42, %v938_v41  ;;  %v1089_v33 = vpop.permute.xlu1 %1088  ;;  %v1123_v39 = vpop.permute.xlu0 %1122  ;;  %v1774_v42 = vmov 92  }
 0x328   : > { %942 = vst [vmem:[#allocation5 + $0x3] ss:$8 sm:$0xf] %v940_v46  ;;  %v952_v50 = vmul.f32 %v947_v45, %v940_v46  ;;  %943 = vst [vmem:[#allocation5 + $0x3] ss:$8 sm:$0xf0] %v940_v46 }
 0x329   : > { %v1775_v46 = vmov 94  }
 0x32a   : > { %v953_v54 = vadd.f32 %v952_v50, %v951_v49  ;;  %v1610_v26 = vpop.eup %1609  ;;  %v1156_v49 = vld [vmem:[%s2287_s8 + $0x20] sm:$0xff]  ;;  %v1155_v50 = vld [vmem:[%s2287_s8 + $0x18] sm:$0xff] }
 0x32b   : > { %v1143_v30 = vadd.f32 1.0, %v1610_v26  ;;  %v1106_v47 = vpop.permute.xlu1 %1105  ;;  %1430 = vmatpush3.msra.mxu0 %v1156_v49 }
 0x32c   : > { %955 = vst [vmem:[#allocation5 + $0x4] ss:$8 sm:$0xf] %v953_v54  ;;  %v965_v58 = vmul.f32 %v960_v53, %v953_v54  ;;  %956 = vst [vmem:[#allocation5 + $0x4] ss:$8 sm:$0xf0] %v953_v54  ;;  %1431 = vmatprep.subr.mxu0 %v1741_v0 }
 0x32d   : > { %1611 = vrcp.f32 %v1143_v30  ;;  %1432 = vmatpush3.msra.mxu0 %v1155_v50  ;;  %v1153_v53 = vld [vmem:[%s2287_s8 + $0x8] sm:$0xff]  ;;  %v1152_v54 = vld [vmem:[%s2287_s8] sm:$0xff] }
 0x32e   : > { %v966_v62 = vadd.f32 %v965_v58, %v964_v57  ;;  %1433 = vmatprep.subr.mxu0 %v1741_v0  ;;  %v1032_v57 = vpop.permute.xlu0 %1031 }
 0x32f   : > { %1434 = vmatpush3.msra.mxu0 %v1154_v52 }
 0x330   : > { %968 = vst [vmem:[#allocation5 + $0x5] ss:$8 sm:$0xf] %v966_v62  ;;  %v978_v3 = vmul.f32 %v973_v61, %v966_v62  ;;  %969 = vst [vmem:[#allocation5 + $0x5] ss:$8 sm:$0xf0] %v966_v62  ;;  %1435 = vmatprep.subr.mxu0 %v1741_v0 }
 0x331   : > { %1436 = vmatpush3.msra.mxu0 %v1153_v53 }
 0x332   : > { %v979_v8 = vadd.f32 %v978_v3, %v977_v2  ;;  %1437 = vmatprep.subr.mxu0 %v1741_v0 }
 0x333   : > { %1438 = vmatpush3.msra.mxu0 %v1152_v54 }
 0x334   : > { %981 = vst [vmem:[#allocation5 + $0x6] ss:$8 sm:$0xf] %v979_v8  ;;  %v991_v11 = vmul.f32 %v986_v7, %v979_v8  ;;  %982 = vst [vmem:[#allocation5 + $0x6] ss:$8 sm:$0xf0] %v979_v8 }
 0x336   : > { %v992_v12 = vadd.f32 %v991_v11, %v990_v10 }
 0x338   : > { %994 = vst [vmem:[#allocation5 + $0x7] ss:$8 sm:$0xf] %v992_v12  ;;  %995 = vst [vmem:[#allocation5 + $0x7] ss:$8 sm:$0xf0] %v992_v12 }
 0x33a   : > { %v1612_v51 = vpop.eup %1611 }
 0x33f   : > { %v2150_v15 = vld [vmem:[#allocation5] sm:$0xff]  ;;  %v2152_v18 = vld [vmem:[#allocation5 + $0x8] sm:$0xff]  ;;  %v2156_v21 = vld [vmem:[#allocation5 + $0x10] sm:$0xff] }
 0x340   : > { %v1006_v19 = vmul.f32 %v1004_v14, %v2150_v15  ;;  %v1023_v6 = vmul.f32 %v1021_v17, %v2152_v18  ;;  %v1040_v22 = vmul.f32 %v1038_v20, %v2156_v21  ;;  %v2161_v23 = vld [vmem:[#allocation5 + $0x18] sm:$0xff]  ;;  %v2166_v27 = vld [vmem:[#allocation5 + $0x20] sm:$0xff]  ;;  %v2171_v32 = vld [vmem:[#allocation5 + $0x28] sm:$0xff]  ;;  %v1034_v63 = vmul.f32 %v1032_v57, %v2156_v21 }
 0x341   : > { %v1057_v25 = vmul.f32 %v1055_v24, %v2161_v23  ;;  %v1074_v31 = vmul.f32 %v1072_v29, %v2166_v27  ;;  %v1091_v35 = vmul.f32 %v1089_v33, %v2171_v32  ;;  %v2176_v36 = vld [vmem:[#allocation5 + $0x38] sm:$0xff]  ;;  %v1097_v45 = vld [vmem:[#allocation5 + $0x30] sm:$0xff] }
 0x342   : > { %1025 = vrot.lane.b32.xlu0 %v1023_v6, %s1761_s20  ;;  %1008 = vrot.lane.b32.xlu1 %v1006_v19, %s1761_s20  ;;  %v1125_v41 = vmul.f32 %v1123_v39, %v2176_v36  ;;  %v1108_v48 = vmul.f32 %v1106_v47, %v1097_v45 }
 0x346   : > { %1042 = vrot.lane.b32.xlu0 %v1040_v22, %s1761_s20  ;;  %1048 = vperm.xlu1 %1563, %v2033_v40  }
 0x34a   : > { %1059 = vrot.lane.b32.xlu0 %v1057_v25, %s1761_s20  ;;  %1564 = vset.pattern.permute.xlu1 %v1772_v28 }
 0x34b   : > { %1065 = vperm.xlu1 %1564, %v2033_v40  }
 0x34e   : > { %1076 = vrot.lane.b32.xlu0 %v1074_v31, %s1761_s20 }
 0x34f   : > { %1565 = vset.pattern.permute.xlu1 %v1773_v34 }
 0x350   : > { %1082 = vperm.xlu1 %1565, %v2033_v40  }
 0x352   : > { %1093 = vrot.lane.b32.xlu0 %v1091_v35, %s1761_s20 }
 0x354   : > { %1566 = vset.pattern.permute.xlu1 %v1774_v42 }
 0x355   : > { %1099 = vperm.xlu1 %1566, %v2033_v40  }
 0x356   : > { %1127 = vrot.lane.b32.xlu0 %v1125_v41, %s1761_s20 }
 0x359   : > { %1567 = vset.pattern.permute.xlu1 %v1775_v46 }
 0x35a   : > { %1116 = vperm.xlu1 %1567, %v2033_v40   ;;  %v1146_v40 = vmul.f32 %v1612_v51, %v2006_v16  ;;  %v999_v16 = vpop.permute.xlu1 %998 }
 0x35b   : > { %v1001_v56 = vmul.f32 %v999_v16, %v2150_v15 }
 0x35e   : > { %1110 = vrot.lane.b32.xlu1 %v1108_v48, %s1761_s20  ;;  %v1015_v55 = vpop.permute.xlu1 %1014 }
 0x35f   : > { %v1017_v59 = vmul.f32 %v1015_v55, %v2152_v18 }
 0x362   : > { %1148 = vrot.lane.b32.xlu1 %v1146_v40, %s1761_s20 }
 0x3b4   : > { %v1009_v58 = vpop.permute.xlu1 %1008  ;;  %v1026_v62 = vpop.permute.xlu0 %1025 }
 0x3b5   : > { %v1011_v60 = vadd.f32 %v1009_v58, %v1001_v56 }
 0x3b7   : > { %v1018_v61 = vadd.f32 %v1017_v59, %v1011_v60 }
 0x3b8   : > { %v1043_v3 = vpop.permute.xlu0 %1042 }
 0x3b9   : > { %v1028_v1 = vadd.f32 %v1026_v62, %v1018_v61 }
 0x3bb   : > { %v1035_v2 = vadd.f32 %v1034_v63, %v1028_v1 }
 0x3bc   : > { %v1060_v8 = vpop.permute.xlu0 %1059 }
 0x3bd   : > { %v1045_v5 = vadd.f32 %v1043_v3, %v1035_v2 }
 0x3c0   : > { %v1077_v13 = vpop.permute.xlu0 %1076 }
 0x3c1   : > { %v1049_v4 = vpop.permute.xlu1 %1048 }
 0x3c2   : > { %v1051_v0 = vmul.f32 %v1049_v4, %v2161_v23 }
 0x3c4   : > { %v1052_v7 = vadd.f32 %v1051_v0, %v1045_v5  ;;  %v1094_v6 = vpop.permute.xlu0 %1093 }
 0x3c6   : > { %v1066_v9 = vpop.permute.xlu1 %1065  ;;  %v1062_v10 = vadd.f32 %v1060_v8, %v1052_v7 }
 0x3c7   : > { %v1068_v11 = vmul.f32 %v1066_v9, %v2166_v27  ;;  %v1363_v27 = vld [vmem:[%s2286_s7] ss:$0 sm:$0xff] }
 0x3c8   : > { %v1128_v29 = vpop.permute.xlu0 %1127  ;;  %v1138_v30 = vmul.f32 %v1363_v27, %v2026_v38 }
 0x3c9   : > { %v1069_v12 = vadd.f32 %v1068_v11, %v1062_v10 }
 0x3cb   : > { %v1083_v14 = vpop.permute.xlu1 %1082  ;;  %v1079_v15 = vadd.f32 %v1077_v13, %v1069_v12 }
 0x3cc   : > { %v1085_v17 = vmul.f32 %v1083_v14, %v2171_v32 }
 0x3ce   : > { %v1086_v18 = vadd.f32 %v1085_v17, %v1079_v15 }
 0x3d0   : > { %v1100_v19 = vpop.permute.xlu1 %1099  ;;  %v1096_v21 = vadd.f32 %v1094_v6, %v1086_v18 }
 0x3d1   : > { %v1102_v20 = vmul.f32 %v1100_v19, %v1097_v45 }
 0x3d3   : > { %v1103_v23 = vadd.f32 %v1102_v20, %v1096_v21 }
 0x3d5   : > { %v1117_v22 = vpop.permute.xlu1 %1116 }
 0x3d6   : > { %v1119_v25 = vmul.f32 %v1117_v22, %v2176_v36 }
 0x3d9   : > { %v1111_v24 = vpop.permute.xlu1 %1110 }
 0x3da   : > { %v1113_v26 = vadd.f32 %v1111_v24, %v1103_v23 }
 0x3dc   : > { %v1120_v28 = vadd.f32 %v1119_v25, %v1113_v26 }
 0x3dd   : > { %v1149_v33 = vpop.permute.xlu1 %1148 }
 0x3de   : > { %v1130_v31 = vadd.f32 %v1128_v29, %v1120_v28 }
 0x3e0   : > { %v1139_v32 = vadd.f32 %v1138_v30, %v1130_v31 }
 0x3e2   : > { %v1151_v34 = vmul.f32 %v1149_v33, %v1139_v32 }
 0x3e4   : > { %1440 = vmatmul.mubr.msk.f32.vlgmr.msra.gmra.mxu0 %vm442_vm2, %v1151_v34 }
 0x4a4   : > { %v1229_v38 = vpop.f32.mrf.mxu0 }
 0x4a5   : > { %1233 = vst.msk [vmem:[%s362_s15] sm:$0xff] %vm368_vm1, %v1229_v38 }
 0x4a6   : > { %v1441_v35 = vpop.f32.mrf.mxu0 }
 0x4a7   : > { %1680 = shalt.err (!%p1677_p0)
}
 0x4a8   : > { %s1681_s21 = scalar_lea.hbm %s2235_s23, 128  ;;  %s1685_s18 = scalar_lea.hbm %s2288_s9, 256 }
 0x4a9   : > { %p1682_p5 = scmp.ne.s32.totalorder %s2235_s23, %s1681_s21  ;;  %p1686_p1 = scmp.lt.s32.totalorder %s2235_s23, %s2288_s9 }
 0x4aa   : > { %p1687_p4 = scmp.lt.s32.totalorder %s1685_s18, %s1681_s21 }
 0x4ab   : > { %p1683_p9 = pnand %p1682_p5, %p2312_p3 }
 0x4ac   : > { %p1688_p6 = por %p1687_p4, %p1686_p1 }
 0x4ad   : > { %p1684_p12 = pneg %p1683_p9 }
 0x4af   : > { %p1689_p8 = pnand %p1688_p6, %p1684_p12 }
 0x4b1   : > { %1692 = shalt.err (!%p1689_p8)
}
 0x4b2   : > { %1448 = dma.vmem_to_hbm [thread:$0]  (%p2312_p3), %s2237_s17, 128, %s2235_s23, %s1235_s25  }
 0x4b3 PF: > { %s2313_s29 = sld [smem:[#allocation15_spill]]  ;;  %s1260_s15 = sand.u32 1, %s1723_s30  }
 0x4b4   : > { %p2315_p7 = scmp.ge.s32.totalorder %s1735_s12, 2  ;;  %s1261_s27 = scalar_lea.sflag [#allocation8], %s1260_s15 }
 0x4b9   : > { %p2314_p11 = scmp.ne.s32.totalorder %s2313_s29, 0 }
 0x4bb   : > { %p1459_p10 = pnand %p2315_p7, %p2314_p11 }
 0x4bd   : > { %p1460_p2 = pneg %p1459_p10 }
 0x4bf   : > { %1718 = dma.done.wait (%p1460_p2), %s1261_s27, 128  }
 0x4c0   : > { %1720 = vsyncadd (%p1460_p2), %s1261_s27, 4294967168  ;;  %s2316_s12 = sld [smem:[#allocation16_spill]]  ;;  %s2318_s30 = smov %s1727_s10 }
 0x4c1   : > { %s2317_s22 = sld [smem:[#allocation17_spill]]  ;;  %s2319_s10 = smov %s1731_s11 }
 0x4c6   : > { %p23_p13 = scmp.ge.s32.totalorder %s2316_s12, 4  }
 0x4c7   : > { %s2320_s11 = smov %s2317_s22 }
 0x4c8   :  { %25 = sbr.rel (!%p23_p13) target bundleno = 8 (0x8), region = 126 }
 0x4cd   :  { %1266 = vsyncpa [#allocation7], 1 }
 0x4ce   :  { %1268 = vsyncpa [#allocation7 + $0x1], 1 }
 0x4cf   :  { %1269 = vsyncpa [#allocation10], 1 }
 0x4d0   :  { %1270 = vsyncpa [#allocation8], 1 }
 0x4d1   :  { %1272 = vsyncpa [#allocation8 + $0x1], 1 }

</bundles_post_ra>
